<compile_context>
chip_gen: v6e
topology: v6e:2x2x1
jax: 0.10.0
libtpu: 0.0.40
codegen_flags: <defaults>
</compile_context>

<pallas_src>
import jax
import jax.numpy as jnp
from jax import lax
from jax.experimental import pallas as pl
from jax.experimental.pallas import tpu as pltpu

CPAD = 128      # padded output-channel width (lane-dense stores on all generations)
K1PAD = 32      # conv1 contraction: 5*5*1  = 25  -> 32
K2PAD = 256     # conv2 contraction: 5*5*10 = 250 -> 256


def _round_up(x, m):
    return (x + m - 1) // m * m


# ---------------------------------------------------------------------------
# Pallas kernels
# ---------------------------------------------------------------------------
def conv_pool_relu_kernel(p_ref, w_ref, b_ref, o_ref):
    # p_ref: (4, TN, K) bf16  -- 4 = 2x2 pool-window positions, rows = pooled output pixels
    # w_ref: (K, 128) bf16, b_ref: (1, 128) f32, o_ref: (TN, 128)
    q, tn, k = p_ref.shape
    x = p_ref[...].reshape(q * tn, k)                        # one MXU feed (4x longer M)
    acc = jnp.dot(x, w_ref[...], preferred_element_type=jnp.float32)   # (4*TN, 128) f32
    m = acc[:tn]
    for i in range(1, q):                                    # max over pool positions (VPU)
        m = jnp.maximum(m, acc[i * tn:(i + 1) * tn])
    o_ref[...] = jnp.maximum(m + b_ref[...], 0.0).astype(o_ref.dtype)


def linear_kernel(x_ref, w_ref, b_ref, o_ref):
    # x_ref: (TB, K) bf16, w_ref: (K, 128) bf16, b_ref: (1, 128) f32, o_ref: (TB, 128) f32
    acc = jnp.dot(x_ref[...], w_ref[...], preferred_element_type=jnp.float32)
    o_ref[...] = (acc + b_ref[...]).astype(o_ref.dtype)


# ---------------------------------------------------------------------------
# Pallas wrappers: N-tiled, "parallel" grid, weights/bias as full (untiled) blocks
# ---------------------------------------------------------------------------
def conv_pool_relu(patches, w_mat, bias, *, out_dtype=jnp.bfloat16, tn_max=512):
    Q, N, K = patches.shape
    C = w_mat.shape[1]
    TN = min(tn_max, _round_up(N, 16))
    Npad = _round_up(N, TN)
    if Npad != N:
        patches = jnp.pad(patches, ((0, 0), (0, Npad - N), (0, 0)))
    out = pl.pallas_call(
        conv_pool_relu_kernel,
        out_shape=jax.ShapeDtypeStruct((Npad, C), out_dtype),
        grid=(Npad // TN,),
        in_specs=[
            pl.BlockSpec((Q, TN, K), lambda n: (0, n, 0)),
            pl.BlockSpec((K, C), lambda n: (0, 0)),
            pl.BlockSpec((1, C), lambda n: (0, 0)),
        ],
        out_specs=pl.BlockSpec((TN, C), lambda n: (n, 0)),
        compiler_params=pltpu.CompilerParams(dimension_semantics=("parallel",)),
    )(patches, w_mat, bias)
    return out[:N]


def linear(x, w_mat, bias, *, out_dtype=jnp.float32, tb_max=256):
    B, K = x.shape
    C = w_mat.shape[1]
    TB = min(tb_max, _round_up(B, 16))
    Bpad = _round_up(B, TB)
    if Bpad != B:
        x = jnp.pad(x, ((0, Bpad - B), (0, 0)))
    out = pl.pallas_call(
        linear_kernel,
        out_shape=jax.ShapeDtypeStruct((Bpad, C), out_dtype),
        grid=(Bpad // TB,),
        in_specs=[
            pl.BlockSpec((TB, K), lambda i: (i, 0)),
            pl.BlockSpec((K, C), lambda i: (0, 0)),
            pl.BlockSpec((1, C), lambda i: (0, 0)),
        ],
        out_specs=pl.BlockSpec((TB, C), lambda i: (i, 0)),
        compiler_params=pltpu.CompilerParams(dimension_semantics=("parallel",)),
    )(x, w_mat, bias)
    return out[:B]


# ---------------------------------------------------------------------------
# Plain-JAX glue: im2col grouped by 2x2 pool windows (K trailing, no big transpose)
# ---------------------------------------------------------------------------
def im2col_pooled(h_nhwc, ksize=5, pool=2, k_pad=None, dtype=jnp.bfloat16):
    # h_nhwc: (B, H, W, C) -> (4, B*PH*PW, Kpad); K ordered (kh, kw, cin); rows = (b, ph, pw).
    B, H, W, C = h_nhwc.shape
    OH, OW = H - ksize + 1, W - ksize + 1
    PH, PW = OH // pool, OW // pool
    K = ksize * ksize * C
    qs = []
    for pi in range(pool):
        for pj in range(pool):
            taps = []
            for kh in range(ksize):
                for kw in range(ksize):
                    r0, c0 = pi + kh, pj + kw
                    taps.append(h_nhwc[:, r0:r0 + pool * (PH - 1) + 1:pool,
                                          c0:c0 + pool * (PW - 1) + 1:pool, :])
            q = jnp.concatenate(taps, axis=-1).reshape(B * PH * PW, K)
            qs.append(q)
    patches = jnp.stack(qs, axis=0)
    if k_pad is not None and k_pad > K:
        patches = jnp.pad(patches, ((0, 0), (0, 0), (0, k_pad - K)))
    return patches.astype(dtype), (B, PH, PW)


def conv_weight_to_mat(w_oihw, k_pad, c_pad, dtype=jnp.bfloat16):
    # (Cout, Cin, KH, KW) -> (k_pad, c_pad), rows ordered (kh, kw, cin), zero padded.
    Cout, Cin, KH, KW = w_oihw.shape
    m = jnp.transpose(w_oihw, (2, 3, 1, 0)).reshape(KH * KW * Cin, Cout)
    m = jnp.pad(m, ((0, k_pad - KH * KW * Cin), (0, c_pad - Cout)))
    return m.astype(dtype)


def fc_weight_to_mat(wf, c_in_real, c_in_pad, spatial, c_out_pad, dtype=jnp.bfloat16):
    # wf: (Cout, c_in_real*spatial) with PyTorch NCHW flatten order (c, h, w).
    # Returns (spatial*c_in_pad, c_out_pad) so the FC consumes the NHWC-flattened,
    # channel-padded conv2 output directly (no activation transpose between kernels).
    Cout = wf.shape[0]
    w = wf.reshape(Cout, c_in_real, spatial)       # (o, c, s)
    w = jnp.transpose(w, (2, 1, 0))                # (s, c, o)
    w = jnp.pad(w, ((0, 0), (0, c_in_pad - c_in_real), (0, c_out_pad - Cout)))
    return w.reshape(spatial * c_in_pad, c_out_pad).astype(dtype)


def pad_bias(b, c_pad):
    return jnp.pad(b, (0, c_pad - b.shape[0])).reshape(1, c_pad).astype(jnp.float32)


def net_forward(x_nchw, params):
    w1, b1, w2, b2, wf, bfc = params
    B = x_nchw.shape[0]
    x = jnp.transpose(x_nchw, (0, 2, 3, 1)).astype(jnp.bfloat16)        # NHWC

    # ---- stage 1: conv1(1->10, k5) + maxpool2 + relu (channels padded 10 -> 128) ----
    p1, (_, PH1, PW1) = im2col_pooled(x, 5, 2, K1PAD)                   # (4, B*144, 32)
    o1 = conv_pool_relu(p1, conv_weight_to_mat(w1, K1PAD, CPAD), pad_bias(b1, CPAD))
    h1 = o1.reshape(B, PH1, PW1, CPAD)[..., :w1.shape[0]]               # (B, 12, 12, 10)

    # ---- stage 2: conv2(10->20, k5) + maxpool2 + relu (channels padded 20 -> 128) ----
    p2, (_, PH2, PW2) = im2col_pooled(h1, 5, 2, K2PAD)                  # (4, B*16, 256)
    o2 = conv_pool_relu(p2, conv_weight_to_mat(w2, K2PAD, CPAD), pad_bias(b2, CPAD))

    # ---- fc: NCHW x.view(B,-1) ordering folded into the FC weight permutation ----
    flat = o2.reshape(B, PH2 * PW2 * CPAD)                              # (B, 2048), free reshape
    wfm = fc_weight_to_mat(wf, w2.shape[0], CPAD, PH2 * PW2, CPAD)      # (2048, 128)
    out = linear(flat, wfm, pad_bias(bfc, CPAD))                        # (B, 128) f32
    return out[:, :wf.shape[0]]                                         # (B, 10)


# ---------------------------------------------------------------------------
# Plain-JAX reference (for correctness check)
# ---------------------------------------------------------------------------
def _maxpool2_nchw(y):
    B, C, H, W = y.shape
    return y.reshape(B, C, H // 2, 2, W // 2, 2).max(axis=(3, 5))


def reference_forward(x, params):
    w1, b1, w2, b2, wf, bfc = params
    dn = ("NCHW", "OIHW", "NCHW")
    hp = lax.Precision.HIGHEST
    y = lax.conv_general_dilated(x, w1, (1, 1), "VALID", dimension_numbers=dn, precision=hp)
    y = jnp.maximum(_maxpool2_nchw(y + b1[None, :, None, None]), 0.0)
    y = lax.conv_general_dilated(y, w2, (1, 1), "VALID", dimension_numbers=dn, precision=hp)
    y = jnp.maximum(_maxpool2_nchw(y + b2[None, :, None, None]), 0.0)
    return jnp.dot(y.reshape(x.shape[0], -1), wf.T, precision=hp) + bfc


# ---------------------------------------------------------------------------
if __name__ == "__main__":
    key = jax.random.PRNGKey(0)
    kx, k1, k2, k3, k4, k5, k6 = jax.random.split(key, 7)

    # Input must be (B, 1, 28, 28) so that the flatten yields 320 features (as fc implies).
    x = jax.random.normal(kx, (2, 1, 28, 28), dtype=jnp.float32)

    # Deterministic synthetic parameters (same shapes as the PyTorch module).
    w1 = jax.random.normal(k1, (10, 1, 5, 5), dtype=jnp.float32) * 0.1
    b1 = jax.random.normal(k2, (10,), dtype=jnp.float32) * 0.1
    w2 = jax.random.normal(k3, (20, 10, 5, 5), dtype=jnp.float32) * 0.05
    b2 = jax.random.normal(k4, (20,), dtype=jnp.float32) * 0.05
    wf = jax.random.normal(k5, (10, 320), dtype=jnp.float32) * 0.05
    bfc = jax.random.normal(k6, (10,), dtype=jnp.float32) * 0.05
    params = (w1, b1, w2, b2, wf, bfc)

    out = jax.jit(net_forward)(x, params)
    out = jax.block_until_ready(out)
    assert out.shape == (2, 10)

    # Kernel path uses bf16 patches/weights with f32 accumulation -> compare against an f32
    # reference evaluated on bf16-rounded inputs/weights (biases stay f32).
    r16 = lambda a: a.astype(jnp.bfloat16).astype(jnp.float32)
    ref = reference_forward(r16(x), (r16(w1), b1, r16(w2), b2, r16(wf), bfc))
    assert jnp.allclose(out, ref, rtol=2e-2, atol=2e-2), (out, ref)

    print("KERNEL_OK")
</pallas_src>

<mosaic_0001>
module attributes {stable_mosaic.version = 11 : i64} {
  func.func @conv_pool_relu_kernel(%arg0: i32, %arg1: memref<4x288x32xbf16, #tpu.memory_space<vmem>>, %arg2: memref<32x128xbf16, #tpu.memory_space<vmem>>, %arg3: memref<1x128xf32, #tpu.memory_space<vmem>>, %arg4: memref<288x128xbf16, #tpu.memory_space<vmem>>) attributes {dimension_semantics = [#tpu.dimension_semantics<parallel>], iteration_bounds = array<i64: 1>, scalar_prefetch = 0 : i64, scratch_operands = 0 : i64, tpu.core_type = #tpu.core_type<tc>, window_params = [{transform_indices = @transform_0, window_bounds = array<i64: 4, 288, 32>}, {pipeline_mode = #tpu.pipeline_mode<synchronous>, transform_indices = @transform_1, window_bounds = array<i64: 32, 128>}, {pipeline_mode = #tpu.pipeline_mode<synchronous>, transform_indices = @transform_2, window_bounds = array<i64: 1, 128>}, {transform_indices = @transform_3, window_bounds = array<i64: 288, 128>}]} {
    %c0 = arith.constant 0 : index
    %c0_0 = arith.constant 0 : index
    %c0_1 = arith.constant 0 : index
    %0 = vector.load %arg1[%c0, %c0_0, %c0_1] : memref<4x288x32xbf16, #tpu.memory_space<vmem>>, vector<4x288x32xbf16>
    %1 = vector.shape_cast %0 : vector<4x288x32xbf16> to vector<1152x32xbf16>
    %c0_2 = arith.constant 0 : index
    %c0_3 = arith.constant 0 : index
    %2 = vector.load %arg2[%c0_2, %c0_3] : memref<32x128xbf16, #tpu.memory_space<vmem>>, vector<32x128xbf16>
    %cst = arith.constant dense<0.000000e+00> : vector<1152x128xf32>
    %3 = tpu.matmul %1, %2, %cst {dimension_numbers = #tpu.dot_dimension_numbers<[1], [0], [0], [1], [0, 0, 1, 1], [], []>} : vector<1152x32xbf16>, vector<32x128xbf16>, vector<1152x128xf32> -> vector<1152x128xf32>
    %4 = vector.extract_strided_slice %3 {offsets = [0, 0], sizes = [288, 128], strides = [1, 1]} : vector<1152x128xf32> to vector<288x128xf32>
    %5 = vector.extract_strided_slice %3 {offsets = [288, 0], sizes = [288, 128], strides = [1, 1]} : vector<1152x128xf32> to vector<288x128xf32>
    %6 = arith.maximumf %4, %5 : vector<288x128xf32>
    %7 = vector.extract_strided_slice %3 {offsets = [576, 0], sizes = [288, 128], strides = [1, 1]} : vector<1152x128xf32> to vector<288x128xf32>
    %8 = arith.maximumf %6, %7 : vector<288x128xf32>
    %9 = vector.extract_strided_slice %3 {offsets = [864, 0], sizes = [288, 128], strides = [1, 1]} : vector<1152x128xf32> to vector<288x128xf32>
    %10 = arith.maximumf %8, %9 : vector<288x128xf32>
    %c0_4 = arith.constant 0 : index
    %c0_5 = arith.constant 0 : index
    %11 = vector.load %arg3[%c0_4, %c0_5] : memref<1x128xf32, #tpu.memory_space<vmem>>, vector<1x128xf32>
    %12 = vector.broadcast %11 : vector<1x128xf32> to vector<288x128xf32>
    %13 = arith.addf %10, %12 : vector<288x128xf32>
    %cst_6 = arith.constant 0.000000e+00 : f32
    %14 = vector.broadcast %cst_6 : f32 to vector<288x128xf32>
    %15 = arith.maximumf %13, %14 : vector<288x128xf32>
    %16 = arith.truncf %15 : vector<288x128xf32> to vector<288x128xbf16>
    %c0_7 = arith.constant 0 : index
    %c0_8 = arith.constant 0 : index
    %17 = vector.load %arg4[%c0_7, %c0_8] : memref<288x128xbf16, #tpu.memory_space<vmem>>, vector<288x128xbf16>
    tpu.vector_store %arg4[%c0_7, %c0_8], %16 {strides = array<i32>} : memref<288x128xbf16, #tpu.memory_space<vmem>>, vector<288x128xbf16>,
    return
  }
  func.func @transform_0(%arg0: i32) -> (i32, i32, i32) {
    %c0_i32 = arith.constant 0 : i32
    %c0_i32_0 = arith.constant 0 : i32
    %c0_i32_1 = arith.constant 0 : i32
    return %c0_i32, %arg0, %c0_i32_0 : i32, i32, i32
  }
  func.func @transform_1(%arg0: i32) -> (i32, i32) {
    %c0_i32 = arith.constant 0 : i32
    %c0_i32_0 = arith.constant 0 : i32
    %c0_i32_1 = arith.constant 0 : i32
    return %c0_i32, %c0_i32_0 : i32, i32
  }
  func.func @transform_2(%arg0: i32) -> (i32, i32) {
    %c0_i32 = arith.constant 0 : i32
    %c0_i32_0 = arith.constant 0 : i32
    %c0_i32_1 = arith.constant 0 : i32
    return %c0_i32, %c0_i32_0 : i32, i32
  }
  func.func @transform_3(%arg0: i32) -> (i32, i32) {
    %c0_i32 = arith.constant 0 : i32
    %c0_i32_0 = arith.constant 0 : i32
    return %arg0, %c0_i32 : i32, i32
  }
}

module attributes {stable_mosaic.version = 11 : i64} {
  func.func @conv_pool_relu_kernel(%arg0: i32, %arg1: memref<4x32x256xbf16, #tpu.memory_space<vmem>>, %arg2: memref<256x128xbf16, #tpu.memory_space<vmem>>, %arg3: memref<1x128xf32, #tpu.memory_space<vmem>>, %arg4: memref<32x128xbf16, #tpu.memory_space<vmem>>) attributes {dimension_semantics = [#tpu.dimension_semantics<parallel>], iteration_bounds = array<i64: 1>, scalar_prefetch = 0 : i64, scratch_operands = 0 : i64, tpu.core_type = #tpu.core_type<tc>, window_params = [{transform_indices = @transform_0, window_bounds = array<i64: 4, 32, 256>}, {pipeline_mode = #tpu.pipeline_mode<synchronous>, transform_indices = @transform_1, window_bounds = array<i64: 256, 128>}, {pipeline_mode = #tpu.pipeline_mode<synchronous>, transform_indices = @transform_2, window_bounds = array<i64: 1, 128>}, {transform_indices = @transform_3, window_bounds = array<i64: 32, 128>}]} {
    %c0 = arith.constant 0 : index
    %c0_0 = arith.constant 0 : index
    %c0_1 = arith.constant 0 : index
    %0 = vector.load %arg1[%c0, %c0_0, %c0_1] : memref<4x32x256xbf16, #tpu.memory_space<vmem>>, vector<4x32x256xbf16>
    %1 = vector.shape_cast %0 : vector<4x32x256xbf16> to vector<128x256xbf16>
    %c0_2 = arith.constant 0 : index
    %c0_3 = arith.constant 0 : index
    %2 = vector.load %arg2[%c0_2, %c0_3] : memref<256x128xbf16, #tpu.memory_space<vmem>>, vector<256x128xbf16>
    %cst = arith.constant dense<0.000000e+00> : vector<128x128xf32>
    %3 = tpu.matmul %1, %2, %cst {dimension_numbers = #tpu.dot_dimension_numbers<[1], [0], [0], [1], [0, 0, 1, 1], [], []>} : vector<128x256xbf16>, vector<256x128xbf16>, vector<128x128xf32> -> vector<128x128xf32>
    %4 = vector.extract_strided_slice %3 {offsets = [0, 0], sizes = [32, 128], strides = [1, 1]} : vector<128x128xf32> to vector<32x128xf32>
    %5 = vector.extract_strided_slice %3 {offsets = [32, 0], sizes = [32, 128], strides = [1, 1]} : vector<128x128xf32> to vector<32x128xf32>
    %6 = arith.maximumf %4, %5 : vector<32x128xf32>
    %7 = vector.extract_strided_slice %3 {offsets = [64, 0], sizes = [32, 128], strides = [1, 1]} : vector<128x128xf32> to vector<32x128xf32>
    %8 = arith.maximumf %6, %7 : vector<32x128xf32>
    %9 = vector.extract_strided_slice %3 {offsets = [96, 0], sizes = [32, 128], strides = [1, 1]} : vector<128x128xf32> to vector<32x128xf32>
    %10 = arith.maximumf %8, %9 : vector<32x128xf32>
    %c0_4 = arith.constant 0 : index
    %c0_5 = arith.constant 0 : index
    %11 = vector.load %arg3[%c0_4, %c0_5] : memref<1x128xf32, #tpu.memory_space<vmem>>, vector<1x128xf32>
    %12 = vector.broadcast %11 : vector<1x128xf32> to vector<32x128xf32>
    %13 = arith.addf %10, %12 : vector<32x128xf32>
    %cst_6 = arith.constant 0.000000e+00 : f32
    %14 = vector.broadcast %cst_6 : f32 to vector<32x128xf32>
    %15 = arith.maximumf %13, %14 : vector<32x128xf32>
    %16 = arith.truncf %15 : vector<32x128xf32> to vector<32x128xbf16>
    %c0_7 = arith.constant 0 : index
    %c0_8 = arith.constant 0 : index
    %17 = vector.load %arg4[%c0_7, %c0_8] : memref<32x128xbf16, #tpu.memory_space<vmem>>, vector<32x128xbf16>
    tpu.vector_store %arg4[%c0_7, %c0_8], %16 {strides = array<i32>} : memref<32x128xbf16, #tpu.memory_space<vmem>>, vector<32x128xbf16>,
    return
  }
  func.func @transform_0(%arg0: i32) -> (i32, i32, i32) {
    %c0_i32 = arith.constant 0 : i32
    %c0_i32_0 = arith.constant 0 : i32
    %c0_i32_1 = arith.constant 0 : i32
    return %c0_i32, %arg0, %c0_i32_0 : i32, i32, i32
  }
  func.func @transform_1(%arg0: i32) -> (i32, i32) {
    %c0_i32 = arith.constant 0 : i32
    %c0_i32_0 = arith.constant 0 : i32
    %c0_i32_1 = arith.constant 0 : i32
    return %c0_i32, %c0_i32_0 : i32, i32
  }
  func.func @transform_2(%arg0: i32) -> (i32, i32) {
    %c0_i32 = arith.constant 0 : i32
    %c0_i32_0 = arith.constant 0 : i32
    %c0_i32_1 = arith.constant 0 : i32
    return %c0_i32, %c0_i32_0 : i32, i32
  }
  func.func @transform_3(%arg0: i32) -> (i32, i32) {
    %c0_i32 = arith.constant 0 : i32
    %c0_i32_0 = arith.constant 0 : i32
    return %arg0, %c0_i32 : i32, i32
  }
}

module attributes {stable_mosaic.version = 11 : i64} {
  func.func @linear_kernel(%arg0: i32, %arg1: memref<16x2048xbf16, #tpu.memory_space<vmem>>, %arg2: memref<2048x128xbf16, #tpu.memory_space<vmem>>, %arg3: memref<1x128xf32, #tpu.memory_space<vmem>>, %arg4: memref<16x128xf32, #tpu.memory_space<vmem>>) attributes {dimension_semantics = [#tpu.dimension_semantics<parallel>], iteration_bounds = array<i64: 1>, scalar_prefetch = 0 : i64, scratch_operands = 0 : i64, tpu.core_type = #tpu.core_type<tc>, window_params = [{transform_indices = @transform_0, window_bounds = array<i64: 16, 2048>}, {pipeline_mode = #tpu.pipeline_mode<synchronous>, transform_indices = @transform_1, window_bounds = array<i64: 2048, 128>}, {pipeline_mode = #tpu.pipeline_mode<synchronous>, transform_indices = @transform_2, window_bounds = array<i64: 1, 128>}, {transform_indices = @transform_3, window_bounds = array<i64: 16, 128>}]} {
    %c0 = arith.constant 0 : index
    %c0_0 = arith.constant 0 : index
    %0 = vector.load %arg1[%c0, %c0_0] : memref<16x2048xbf16, #tpu.memory_space<vmem>>, vector<16x2048xbf16>
    %c0_1 = arith.constant 0 : index
    %c0_2 = arith.constant 0 : index
    %1 = vector.load %arg2[%c0_1, %c0_2] : memref<2048x128xbf16, #tpu.memory_space<vmem>>, vector<2048x128xbf16>
    %cst = arith.constant dense<0.000000e+00> : vector<16x128xf32>
    %2 = tpu.matmul %0, %1, %cst {dimension_numbers = #tpu.dot_dimension_numbers<[1], [0], [0], [1], [0, 0, 1, 1], [], []>} : vector<16x2048xbf16>, vector<2048x128xbf16>, vector<16x128xf32> -> vector<16x128xf32>
    %c0_3 = arith.constant 0 : index
    %c0_4 = arith.constant 0 : index
    %3 = vector.load %arg3[%c0_3, %c0_4] : memref<1x128xf32, #tpu.memory_space<vmem>>, vector<1x128xf32>
    %4 = vector.broadcast %3 : vector<1x128xf32> to vector<16x128xf32>
    %5 = arith.addf %2, %4 : vector<16x128xf32>
    %c0_5 = arith.constant 0 : index
    %c0_6 = arith.constant 0 : index
    %6 = vector.load %arg4[%c0_5, %c0_6] : memref<16x128xf32, #tpu.memory_space<vmem>>, vector<16x128xf32>
    tpu.vector_store %arg4[%c0_5, %c0_6], %5 {strides = array<i32>} : memref<16x128xf32, #tpu.memory_space<vmem>>, vector<16x128xf32>,
    return
  }
  func.func @transform_0(%arg0: i32) -> (i32, i32) {
    %c0_i32 = arith.constant 0 : i32
    %c0_i32_0 = arith.constant 0 : i32
    return %arg0, %c0_i32 : i32, i32
  }
  func.func @transform_1(%arg0: i32) -> (i32, i32) {
    %c0_i32 = arith.constant 0 : i32
    %c0_i32_0 = arith.constant 0 : i32
    %c0_i32_1 = arith.constant 0 : i32
    return %c0_i32, %c0_i32_0 : i32, i32
  }
  func.func @transform_2(%arg0: i32) -> (i32, i32) {
    %c0_i32 = arith.constant 0 : i32
    %c0_i32_0 = arith.constant 0 : i32
    %c0_i32_1 = arith.constant 0 : i32
    return %c0_i32, %c0_i32_0 : i32, i32
  }
  func.func @transform_3(%arg0: i32) -> (i32, i32) {
    %c0_i32 = arith.constant 0 : i32
    %c0_i32_0 = arith.constant 0 : i32
    return %arg0, %c0_i32 : i32, i32
  }
}

</mosaic_0001>

<bundles_post_ra>
// kernel: net_forward.3
= control target key start
LH: loop header
LB: loop body
LE: loop exit
PB: predicated region body
PF: predicated region fallthrough
CT: control target
= control target key end

     0   :  { %vm535_vm0 = vcmask 261120   ;;  %s2983_s1 = inlined_call_operand.vmem [shape: bf16[32,128], index: 1, kind: input, shape index: {}]   ;;  %s2984_s0 = inlined_call_operand.vmem [shape: bf16[4,288,32], index: 0, kind: input, shape index: {}]   ;;  %s2985_s2 = inlined_call_operand.vmem [shape: f32[1,128], index: 2, kind: input, shape index: {}]   ;;  %s2986_s3 = inlined_call_operand.vmem [shape: bf16[288,128], index: 3, kind: output, shape index: {}]  }
   0x1   :  { %v2284_v0 = vld [vmem:[%s2983_s1 + $0x8] sm:$0xff]   ;;  %v2285_v1 = vld [vmem:[%s2983_s1] sm:$0xff]   ;;  %v2290_v6 = vld [vmem:[%s2984_s0 + $0x10] sm:$0xff]  }
   0x2   :  { %2132 = vmatprep.subr.bf16.mxu0 %v2284_v0  ;;  %2280 = vmatprep.subr.bf16.mxu1 %v2284_v0  ;;  %v2286_v2 = vld [vmem:[%s2984_s0] sm:$0xff]   ;;  %v2288_v4 = vld [vmem:[%s2984_s0 + $0x8] sm:$0xff]   ;;  %v2291_v7 = vld [vmem:[%s2984_s0 + $0x130] sm:$0xff]  }
   0x3   :  { %2133 = vmatpush3.bf16.msra.mxu0 %v2284_v0  ;;  %2282 = vmatpush3.bf16.msra.mxu1 %v2284_v0  ;;  %v2287_v3 = vld [vmem:[%s2984_s0 + $0x120] sm:$0xff]   ;;  %v2289_v5 = vld [vmem:[%s2984_s0 + $0x128] sm:$0xff]   ;;  %v2292_v8 = vld [vmem:[%s2984_s0 + $0x18] sm:$0xff]  }
   0x4   :  { %2134 = vmatprep.subr.bf16.mxu0 %v2285_v1  ;;  %2281 = vmatprep.subr.bf16.mxu1 %v2285_v1  ;;  %v2293_v9 = vld [vmem:[%s2984_s0 + $0x138] sm:$0xff]   ;;  %v2294_v10 = vld [vmem:[%s2984_s0 + $0x20] sm:$0xff]   ;;  %v2296_v12 = vld [vmem:[%s2984_s0 + $0x28] sm:$0xff]  }
   0x5   :  { %2136 = vmatprep.mubr.msk.bf16.mxu0 %vm535_vm0, %v2286_v2  ;;  %2208 = vmatprep.mubr.msk.bf16.mxu1 %vm535_vm0, %v2287_v3  ;;  %v2295_v11 = vld [vmem:[%s2984_s0 + $0x140] sm:$0xff]   ;;  %v2297_v13 = vld [vmem:[%s2984_s0 + $0x148] sm:$0xff]   ;;  %v2298_v14 = vld [vmem:[%s2984_s0 + $0x30] sm:$0xff]  }
   0x6   :  { %v2299_v15 = vld [vmem:[%s2984_s0 + $0x150] sm:$0xff]   ;;  %v2300_v16 = vld [vmem:[%s2984_s0 + $0x38] sm:$0xff]   ;;  %v2302_v18 = vld [vmem:[%s2984_s0 + $0x40] sm:$0xff]  }
   0x7   :  { %2135 = vmatpush3.bf16.msra.mxu0 %v2285_v1  ;;  %2283 = vmatpush3.bf16.msra.mxu1 %v2285_v1  ;;  %v2301_v17 = vld [vmem:[%s2984_s0 + $0x158] sm:$0xff]   ;;  %v2303_v19 = vld [vmem:[%s2984_s0 + $0x160] sm:$0xff]   ;;  %v2304_v20 = vld [vmem:[%s2984_s0 + $0x48] sm:$0xff]  }
   0x8   :  { %v2305_v21 = vld [vmem:[%s2984_s0 + $0x168] sm:$0xff]   ;;  %v2306_v22 = vld [vmem:[%s2984_s0 + $0x50] sm:$0xff]   ;;  %v2308_v24 = vld [vmem:[%s2984_s0 + $0x58] sm:$0xff]  }
   0x9   :  { %v2307_v23 = vld [vmem:[%s2984_s0 + $0x170] sm:$0xff]   ;;  %v2309_v25 = vld [vmem:[%s2984_s0 + $0x178] sm:$0xff]   ;;  %v2310_v26 = vld [vmem:[%s2984_s0 + $0x60] sm:$0xff]  }
   0xa   :  { %2137 = vmatmul.mubr.msk.bf16.vlgmr.msra.gmra.mxu0 %vm535_vm0, %v2288_v4  ;;  %2209 = vmatmul.mubr.msk.bf16.vlgmr.msra.gmra.mxu1 %vm535_vm0, %v2289_v5  ;;  %v2311_v27 = vld [vmem:[%s2984_s0 + $0x180] sm:$0xff]   ;;  %v2312_v28 = vld [vmem:[%s2984_s0 + $0x68] sm:$0xff]   ;;  %v2314_v30 = vld [vmem:[%s2984_s0 + $0x70] sm:$0xff]  }
   0xb   :  { %2140 = vmatprep.mubr.msk.bf16.mxu0 %vm535_vm0, %v2290_v6  ;;  %2212 = vmatprep.mubr.msk.bf16.mxu1 %vm535_vm0, %v2291_v7  ;;  %v2313_v29 = vld [vmem:[%s2984_s0 + $0x188] sm:$0xff]   ;;  %v2315_v31 = vld [vmem:[%s2984_s0 + $0x190] sm:$0xff]   ;;  %v2316_v32 = vld [vmem:[%s2984_s0 + $0x78] sm:$0xff]  }
   0xc   :  { %v2317_v33 = vld [vmem:[%s2984_s0 + $0x198] sm:$0xff]   ;;  %v2318_v34 = vld [vmem:[%s2984_s0 + $0x80] sm:$0xff]   ;;  %v2320_v36 = vld [vmem:[%s2984_s0 + $0x88] sm:$0xff]  }
   0xd   :  { %v2319_v35 = vld [vmem:[%s2984_s0 + $0x1a0] sm:$0xff]   ;;  %v2321_v37 = vld [vmem:[%s2984_s0 + $0x1a8] sm:$0xff]   ;;  %v2322_v38 = vld [vmem:[%s2984_s0 + $0x90] sm:$0xff]  }
   0xe   :  { %v2323_v39 = vld [vmem:[%s2984_s0 + $0x1b0] sm:$0xff]   ;;  %v2324_v40 = vld [vmem:[%s2984_s0 + $0x98] sm:$0xff]   ;;  %v2326_v42 = vld [vmem:[%s2984_s0 + $0xa0] sm:$0xff]  }
   0xf   :  { %v2325_v41 = vld [vmem:[%s2984_s0 + $0x1b8] sm:$0xff]   ;;  %v2327_v43 = vld [vmem:[%s2984_s0 + $0x1c0] sm:$0xff]   ;;  %v2328_v44 = vld [vmem:[%s2984_s0 + $0xa8] sm:$0xff]  }
  0x10   :  { %v2329_v45 = vld [vmem:[%s2984_s0 + $0x1c8] sm:$0xff]   ;;  %v2330_v46 = vld [vmem:[%s2984_s0 + $0xb0] sm:$0xff]   ;;  %v2332_v48 = vld [vmem:[%s2984_s0 + $0xb8] sm:$0xff]  }
  0x11   :  { %v2331_v47 = vld [vmem:[%s2984_s0 + $0x1d0] sm:$0xff]   ;;  %v2333_v49 = vld [vmem:[%s2984_s0 + $0x1d8] sm:$0xff]   ;;  %v2334_v50 = vld [vmem:[%s2984_s0 + $0xc0] sm:$0xff]  }
  0x12   :  { %2141 = vmatmul.mubr.msk.bf16.gmra.mxu0 %vm535_vm0, %v2292_v8  ;;  %2213 = vmatmul.mubr.msk.bf16.gmra.mxu1 %vm535_vm0, %v2293_v9  ;;  %v2335_v51 = vld [vmem:[%s2984_s0 + $0x1e0] sm:$0xff]   ;;  %v2336_v52 = vld [vmem:[%s2984_s0 + $0xc8] sm:$0xff]   ;;  %v2338_v54 = vld [vmem:[%s2984_s0 + $0xd0] sm:$0xff]  }
  0x13   :  { %2144 = vmatprep.mubr.msk.bf16.mxu0 %vm535_vm0, %v2294_v10  ;;  %2216 = vmatprep.mubr.msk.bf16.mxu1 %vm535_vm0, %v2295_v11  ;;  %v2337_v53 = vld [vmem:[%s2984_s0 + $0x1e8] sm:$0xff]   ;;  %v2339_v55 = vld [vmem:[%s2984_s0 + $0x1f0] sm:$0xff]   ;;  %v2340_v56 = vld [vmem:[%s2984_s0 + $0xd8] sm:$0xff]  }
  0x14   :  { %v2341_v57 = vld [vmem:[%s2984_s0 + $0x1f8] sm:$0xff]   ;;  %v2342_v58 = vld [vmem:[%s2984_s0 + $0xe0] sm:$0xff]   ;;  %v2344_v60 = vld [vmem:[%s2984_s0 + $0xe8] sm:$0xff]  }
  0x15   :  { %v2343_v59 = vld [vmem:[%s2984_s0 + $0x200] sm:$0xff]   ;;  %v2345_v61 = vld [vmem:[%s2984_s0 + $0x208] sm:$0xff]   ;;  %v2346_v62 = vld [vmem:[%s2984_s0 + $0xf0] sm:$0xff]  }
  0x16   :  { %v2347_v63 = vld [vmem:[%s2984_s0 + $0x210] sm:$0xff]   ;;  %v2348_v0 = vld [vmem:[%s2984_s0 + $0xf8] sm:$0xff]   ;;  %v2350_v2 = vld [vmem:[%s2984_s0 + $0x100] sm:$0xff]  }
  0x17   :  { %v2349_v1 = vld [vmem:[%s2984_s0 + $0x218] sm:$0xff]   ;;  %v2351_v3 = vld [vmem:[%s2984_s0 + $0x220] sm:$0xff]   ;;  %v2352_v4 = vld [vmem:[%s2984_s0 + $0x108] sm:$0xff]  }
  0x18   :  { %v2353_v5 = vld [vmem:[%s2984_s0 + $0x228] sm:$0xff]   ;;  %v2354_v6 = vld [vmem:[%s2984_s0 + $0x110] sm:$0xff]   ;;  %v2356_v8 = vld [vmem:[%s2984_s0 + $0x118] sm:$0xff]  }
  0x19   :  { %v2355_v7 = vld [vmem:[%s2984_s0 + $0x230] sm:$0xff]   ;;  %v2357_v9 = vld [vmem:[%s2984_s0 + $0x238] sm:$0xff]  }
  0x1a   :  { %2145 = vmatmul.mubr.msk.bf16.gmra.mxu0 %vm535_vm0, %v2296_v12  ;;  %2217 = vmatmul.mubr.msk.bf16.gmra.mxu1 %vm535_vm0, %v2297_v13 }
  0x1b   :  { %2148 = vmatprep.mubr.msk.bf16.mxu0 %vm535_vm0, %v2298_v14  ;;  %2220 = vmatprep.mubr.msk.bf16.mxu1 %vm535_vm0, %v2299_v15 }
  0x22   :  { %2149 = vmatmul.mubr.msk.bf16.gmra.mxu0 %vm535_vm0, %v2300_v16  ;;  %2221 = vmatmul.mubr.msk.bf16.gmra.mxu1 %vm535_vm0, %v2301_v17 }
  0x23   :  { %2152 = vmatprep.mubr.msk.bf16.mxu0 %vm535_vm0, %v2302_v18  ;;  %2224 = vmatprep.mubr.msk.bf16.mxu1 %vm535_vm0, %v2303_v19 }
  0x2a   :  { %2153 = vmatmul.mubr.msk.bf16.gmra.mxu0 %vm535_vm0, %v2304_v20  ;;  %2225 = vmatmul.mubr.msk.bf16.gmra.mxu1 %vm535_vm0, %v2305_v21 }
  0x2b   :  { %2156 = vmatprep.mubr.msk.bf16.mxu0 %vm535_vm0, %v2306_v22  ;;  %2228 = vmatprep.mubr.msk.bf16.mxu1 %vm535_vm0, %v2307_v23 }
  0x32   :  { %2157 = vmatmul.mubr.msk.bf16.gmra.mxu0 %vm535_vm0, %v2308_v24  ;;  %2229 = vmatmul.mubr.msk.bf16.gmra.mxu1 %vm535_vm0, %v2309_v25 }
  0x33   :  { %2160 = vmatprep.mubr.msk.bf16.mxu0 %vm535_vm0, %v2310_v26  ;;  %2232 = vmatprep.mubr.msk.bf16.mxu1 %vm535_vm0, %v2311_v27 }
  0x3a   :  { %2161 = vmatmul.mubr.msk.bf16.gmra.mxu0 %vm535_vm0, %v2312_v28  ;;  %2233 = vmatmul.mubr.msk.bf16.gmra.mxu1 %vm535_vm0, %v2313_v29 }
  0x3b   :  { %2164 = vmatprep.mubr.msk.bf16.mxu0 %vm535_vm0, %v2314_v30  ;;  %2236 = vmatprep.mubr.msk.bf16.mxu1 %vm535_vm0, %v2315_v31 }
  0x42   :  { %2165 = vmatmul.mubr.msk.bf16.gmra.mxu0 %vm535_vm0, %v2316_v32  ;;  %2237 = vmatmul.mubr.msk.bf16.gmra.mxu1 %vm535_vm0, %v2317_v33 }
  0x43   :  { %2168 = vmatprep.mubr.msk.bf16.mxu0 %vm535_vm0, %v2318_v34  ;;  %2240 = vmatprep.mubr.msk.bf16.mxu1 %vm535_vm0, %v2319_v35 }
  0x4a   :  { %2169 = vmatmul.mubr.msk.bf16.gmra.mxu0 %vm535_vm0, %v2320_v36  ;;  %2241 = vmatmul.mubr.msk.bf16.gmra.mxu1 %vm535_vm0, %v2321_v37 }
  0x4b   :  { %2172 = vmatprep.mubr.msk.bf16.mxu0 %vm535_vm0, %v2322_v38  ;;  %2244 = vmatprep.mubr.msk.bf16.mxu1 %vm535_vm0, %v2323_v39 }
  0x52   :  { %2173 = vmatmul.mubr.msk.bf16.gmra.mxu0 %vm535_vm0, %v2324_v40  ;;  %2245 = vmatmul.mubr.msk.bf16.gmra.mxu1 %vm535_vm0, %v2325_v41 }
  0x53   :  { %2176 = vmatprep.mubr.msk.bf16.mxu0 %vm535_vm0, %v2326_v42  ;;  %2248 = vmatprep.mubr.msk.bf16.mxu1 %vm535_vm0, %v2327_v43 }
  0x5a   :  { %2177 = vmatmul.mubr.msk.bf16.gmra.mxu0 %vm535_vm0, %v2328_v44  ;;  %2249 = vmatmul.mubr.msk.bf16.gmra.mxu1 %vm535_vm0, %v2329_v45 }
  0x5b   :  { %2180 = vmatprep.mubr.msk.bf16.mxu0 %vm535_vm0, %v2330_v46  ;;  %2252 = vmatprep.mubr.msk.bf16.mxu1 %vm535_vm0, %v2331_v47 }
  0x62   :  { %2181 = vmatmul.mubr.msk.bf16.gmra.mxu0 %vm535_vm0, %v2332_v48  ;;  %2253 = vmatmul.mubr.msk.bf16.gmra.mxu1 %vm535_vm0, %v2333_v49 }
  0x63   :  { %2184 = vmatprep.mubr.msk.bf16.mxu0 %vm535_vm0, %v2334_v50  ;;  %2256 = vmatprep.mubr.msk.bf16.mxu1 %vm535_vm0, %v2335_v51 }
  0x6a   :  { %2185 = vmatmul.mubr.msk.bf16.gmra.mxu0 %vm535_vm0, %v2336_v52  ;;  %2257 = vmatmul.mubr.msk.bf16.gmra.mxu1 %vm535_vm0, %v2337_v53 }
  0x6b   :  { %2188 = vmatprep.mubr.msk.bf16.mxu0 %vm535_vm0, %v2338_v54  ;;  %2260 = vmatprep.mubr.msk.bf16.mxu1 %vm535_vm0, %v2339_v55 }
  0x72   :  { %2189 = vmatmul.mubr.msk.bf16.gmra.mxu0 %vm535_vm0, %v2340_v56  ;;  %2261 = vmatmul.mubr.msk.bf16.gmra.mxu1 %vm535_vm0, %v2341_v57 }
  0x73   :  { %2192 = vmatprep.mubr.msk.bf16.mxu0 %vm535_vm0, %v2342_v58  ;;  %2264 = vmatprep.mubr.msk.bf16.mxu1 %vm535_vm0, %v2343_v59 }
  0x7a   :  { %2193 = vmatmul.mubr.msk.bf16.gmra.mxu0 %vm535_vm0, %v2344_v60  ;;  %2265 = vmatmul.mubr.msk.bf16.gmra.mxu1 %vm535_vm0, %v2345_v61 }
  0x7b   :  { %2196 = vmatprep.mubr.msk.bf16.mxu0 %vm535_vm0, %v2346_v62  ;;  %2268 = vmatprep.mubr.msk.bf16.mxu1 %vm535_vm0, %v2347_v63 }
  0x82   :  { %2197 = vmatmul.mubr.msk.bf16.gmra.mxu0 %vm535_vm0, %v2348_v0  ;;  %2269 = vmatmul.mubr.msk.bf16.gmra.mxu1 %vm535_vm0, %v2349_v1 }
  0x83   :  { %2200 = vmatprep.mubr.msk.bf16.mxu0 %vm535_vm0, %v2350_v2  ;;  %2272 = vmatprep.mubr.msk.bf16.mxu1 %vm535_vm0, %v2351_v3 }
  0x8a   :  { %2201 = vmatmul.mubr.msk.bf16.gmra.mxu0 %vm535_vm0, %v2352_v4  ;;  %2273 = vmatmul.mubr.msk.bf16.gmra.mxu1 %vm535_vm0, %v2353_v5 }
  0x8b   :  { %2204 = vmatprep.mubr.msk.bf16.mxu0 %vm535_vm0, %v2354_v6  ;;  %2276 = vmatprep.mubr.msk.bf16.mxu1 %vm535_vm0, %v2355_v7 }
  0x92   :  { %2205 = vmatmul.mubr.msk.bf16.gmra.mxu0 %vm535_vm0, %v2356_v8  ;;  %2277 = vmatmul.mubr.msk.bf16.gmra.mxu1 %vm535_vm0, %v2357_v9 }
  0xca   :  { %v2672_v10 = vpop.f32.mrf.mxu0  ;;  %v2674_v11 = vpop.f32.mrf.mxu1 }
  0xcc   :  { %v2676_v12 = vpop.f32.mrf.mxu0  ;;  %v2678_v13 = vpop.f32.mrf.mxu1 }
  0xce   :  { %v2680_v14 = vpop.f32.mrf.mxu0  ;;  %v2682_v15 = vpop.f32.mrf.mxu1 }
  0xd0   :  { %v2684_v16 = vpop.f32.mrf.mxu0  ;;  %v2686_v17 = vpop.f32.mrf.mxu1 }
  0xd2   :  { %v2688_v18 = vpop.f32.mrf.mxu0  ;;  %v2690_v19 = vpop.f32.mrf.mxu1 }
  0xd4   :  { %v2692_v20 = vpop.f32.mrf.mxu0  ;;  %v2694_v21 = vpop.f32.mrf.mxu1 }
  0xd6   :  { %v2696_v22 = vpop.f32.mrf.mxu0  ;;  %v2698_v23 = vpop.f32.mrf.mxu1 }
  0xd8   :  { %v2700_v24 = vpop.f32.mrf.mxu0  ;;  %v2702_v25 = vpop.f32.mrf.mxu1 }
  0xda   :  { %v2704_v26 = vpop.f32.mrf.mxu0  ;;  %v2706_v27 = vpop.f32.mrf.mxu1 }
  0xdc   :  { %v2708_v28 = vpop.f32.mrf.mxu0  ;;  %v2710_v29 = vpop.f32.mrf.mxu1 }
  0xde   :  { %v2712_v30 = vpop.f32.mrf.mxu0  ;;  %v2714_v31 = vpop.f32.mrf.mxu1 }
  0xe0   :  { %v2716_v32 = vpop.f32.mrf.mxu0  ;;  %v2718_v33 = vpop.f32.mrf.mxu1 }
  0xe2   :  { %v2720_v34 = vpop.f32.mrf.mxu0  ;;  %v2722_v35 = vpop.f32.mrf.mxu1 }
  0xe4   :  { %v2724_v36 = vpop.f32.mrf.mxu0  ;;  %v2726_v37 = vpop.f32.mrf.mxu1 }
  0xe6   :  { %v2728_v38 = vpop.f32.mrf.mxu0  ;;  %v2730_v39 = vpop.f32.mrf.mxu1 }
  0xe8   :  { %v2732_v40 = vpop.f32.mrf.mxu0  ;;  %v2734_v41 = vpop.f32.mrf.mxu1 }
  0xea   :  { %v2736_v42 = vpop.f32.mrf.mxu0  ;;  %v2738_v43 = vpop.f32.mrf.mxu1 }
  0xec   :  { %v2740_v44 = vpop.f32.mrf.mxu0  ;;  %v2742_v45 = vpop.f32.mrf.mxu1 }
  0xee   :  { %v2744_v46 = vpop.f32.mrf.mxu0  ;;  %v2746_v47 = vpop.f32.mrf.mxu1 }
  0xf0   :  { %v2748_v48 = vpop.f32.mrf.mxu0  ;;  %v2750_v49 = vpop.f32.mrf.mxu1 }
  0xf2   :  { %v2752_v50 = vpop.f32.mrf.mxu0  ;;  %v2754_v51 = vpop.f32.mrf.mxu1 }
  0xf4   :  { %v2756_v52 = vpop.f32.mrf.mxu0  ;;  %v2758_v53 = vpop.f32.mrf.mxu1 }
  0xf6   :  { %v2760_v54 = vpop.f32.mrf.mxu0  ;;  %v2762_v55 = vpop.f32.mrf.mxu1 }
  0xf8   :  { %v2764_v56 = vpop.f32.mrf.mxu0  ;;  %v2766_v57 = vpop.f32.mrf.mxu1 }
  0xf9   :  { %2987 = vst [vmem:[#allocation2_spill] sm:$0xff] %v2766_v57 }
  0xfa   :  { %v2768_v58 = vpop.f32.mrf.mxu0  ;;  %v2770_v59 = vpop.f32.mrf.mxu1 }
  0xfb   :  { %2988 = vst [vmem:[#allocation3_spill] sm:$0xff] %v2768_v58  ;;  %2989 = vst [vmem:[#allocation4_spill] sm:$0xff] %v2770_v59 }
  0xfc   :  { %v2772_v60 = vpop.f32.mrf.mxu0  ;;  %v2774_v61 = vpop.f32.mrf.mxu1 }
  0xfd   :  { %2990 = vst [vmem:[#allocation5_spill] sm:$0xff] %v2772_v60  ;;  %2991 = vst [vmem:[#allocation6_spill] sm:$0xff] %v2774_v61 }
  0xfe   :  { %v2776_v62 = vpop.f32.mrf.mxu0  ;;  %v2778_v63 = vpop.f32.mrf.mxu1 }
  0xff   :  { %2992 = vst [vmem:[#allocation7_spill] sm:$0xff] %v2776_v62  ;;  %2993 = vst [vmem:[#allocation8_spill] sm:$0xff] %v2778_v63 }
 0x100   :  { %v2780_v0 = vpop.f32.mrf.mxu0  ;;  %v2782_v1 = vpop.f32.mrf.mxu1 }
 0x101   :  { %2994 = vst [vmem:[#allocation9_spill] sm:$0xff] %v2780_v0  ;;  %2995 = vst [vmem:[#allocation10_spill] sm:$0xff] %v2782_v1 }
 0x102   :  { %v2784_v2 = vpop.f32.mrf.mxu0  ;;  %v2786_v3 = vpop.f32.mrf.mxu1 }
 0x103   :  { %2996 = vst [vmem:[#allocation11_spill] sm:$0xff] %v2784_v2  ;;  %2997 = vst [vmem:[#allocation12_spill] sm:$0xff] %v2786_v3 }
 0x104   :  { %v2788_v4 = vpop.f32.mrf.mxu0  ;;  %v2790_v5 = vpop.f32.mrf.mxu1 }
 0x105   :  { %2998 = vst [vmem:[#allocation13_spill] sm:$0xff] %v2788_v4  ;;  %2999 = vst [vmem:[#allocation14_spill] sm:$0xff] %v2790_v5 }
 0x106   :  { %v2792_v6 = vpop.f32.mrf.mxu0  ;;  %v2794_v7 = vpop.f32.mrf.mxu1 }
 0x107   :  { %3000 = vst [vmem:[#allocation15_spill] sm:$0xff] %v2792_v6  ;;  %3001 = vst [vmem:[#allocation16_spill] sm:$0xff] %v2794_v7 }
 0x108   :  { %v2796_v8 = vpop.f32.mrf.mxu0  ;;  %v2798_v9 = vpop.f32.mrf.mxu1 }
 0x109   :  { %3002 = vst [vmem:[#allocation17_spill] sm:$0xff] %v2796_v8  ;;  %3003 = vst [vmem:[#allocation18_spill] sm:$0xff] %v2798_v9 }
 0x10a   :  { %v2800_v63 = vpop.f32.mrf.mxu0  ;;  %v2802_v0 = vpop.f32.mrf.mxu1 }
 0x10b   :  { %3004 = vst [vmem:[#allocation19_spill] sm:$0xff] %v2800_v63  ;;  %3005 = vst [vmem:[#allocation20_spill] sm:$0xff] %v2802_v0 }
 0x10c   :  { %v2804_v1 = vpop.f32.mrf.mxu0  ;;  %v2806_v2 = vpop.f32.mrf.mxu1 }
 0x10d   :  { %3006 = vst [vmem:[#allocation21_spill] sm:$0xff] %v2804_v1  ;;  %3007 = vst [vmem:[#allocation22_spill] sm:$0xff] %v2806_v2 }
 0x10e   :  { %v2808_v3 = vpop.f32.mrf.mxu0  ;;  %v2810_v4 = vpop.f32.mrf.mxu1 }
 0x10f   :  { %3008 = vst [vmem:[#allocation23_spill] sm:$0xff] %v2808_v3  ;;  %3009 = vst [vmem:[#allocation24_spill] sm:$0xff] %v2810_v4  ;;  %v2822_v4 = vld [vmem:[%s2985_s2] ss:$0 sm:$0xff] }
 0x110   :  { %v2812_v5 = vpop.f32.mrf.mxu0  ;;  %v2814_v6 = vpop.f32.mrf.mxu1 }
 0x111   :  { %3010 = vst [vmem:[#allocation25_spill] sm:$0xff] %v2812_v5  ;;  %3011 = vst [vmem:[#allocation26_spill] sm:$0xff] %v2814_v6 }
 0x112   :  { %v2174_v7 = vpop.f32.mrf.mxu0  ;;  %v2246_v8 = vpop.f32.mrf.mxu1 }
 0x113   :  { %v1363_v9 = vmax.f32 %v2672_v10, %v2174_v7 }
 0x114   :  { %v930_v62 = vpop.f32.mrf.mxu0  ;;  %v1218_v63 = vpop.f32.mrf.mxu1 }
 0x115   :  { %v1399_v0 = vmax.f32 %v1363_v9, %v2674_v11  ;;  %v1361_v1 = vmax.f32 %v2676_v12, %v930_v62 }
 0x116   :  { %v2175_v61 = vpop.f32.mrf.mxu0  ;;  %v2247_v2 = vpop.f32.mrf.mxu1 }
 0x117   :  { %v1435_v60 = vmax.f32 %v1399_v0, %v2246_v8  ;;  %v1397_v6 = vmax.f32 %v1361_v1, %v2678_v13  ;;  %v1364_v5 = vmax.f32 %v2680_v14, %v2175_v61 }
 0x118   :  { %v933_v3 = vpop.f32.mrf.mxu0  ;;  %v1221_v10 = vpop.f32.mrf.mxu1 }
 0x119   :  { %v1433_v7 = vmax.f32 %v1397_v6, %v1218_v63  ;;  %v1400_v59 = vmax.f32 %v1364_v5, %v2682_v15  ;;  %v1362_v11 = vmax.f32 %v2684_v16, %v933_v3  ;;  %v1478_v12 = vadd.f32 %v2822_v4, %v1435_v60 }
 0x11a   :  { %v2178_v62 = vpop.f32.mrf.mxu0  ;;  %v2250_v0 = vpop.f32.mrf.mxu1 }
 0x11b   :  { %v1436_v8 = vmax.f32 %v1400_v59, %v2247_v2  ;;  %v1398_v9 = vmax.f32 %v1362_v11, %v2686_v17  ;;  %v1367_v57 = vmax.f32 %v2688_v18, %v2178_v62  ;;  %v1476_v14 = vadd.f32 %v2822_v4, %v1433_v7 }
 0x11c   :  { %v946_v58 = vpop.f32.mrf.mxu0  ;;  %v1234_v13 = vpop.f32.mrf.mxu1  ;;  %v1514_v1 = vmax.f32 %v1478_v12, 0.0 }
 0x11d   :  { %v1479_v61 = vadd.f32 %v2822_v4, %v1436_v8  ;;  %v1434_v63 = vmax.f32 %v1398_v9, %v1221_v10  ;;  %v1365_v15 = vmax.f32 %v2692_v20, %v946_v58  ;;  %v1403_v16 = vmax.f32 %v1367_v57, %v2690_v19 }
 0x11e   :  { %v2179_v60 = vpop.f32.mrf.mxu0  ;;  %v2251_v3 = vpop.f32.mrf.mxu1  ;;  %v1512_v11 = vmax.f32 %v1476_v14, 0.0 }
 0x11f   :  { %v1515_v5 = vmax.f32 %v1479_v61, 0.0  ;;  %v1477_v59 = vadd.f32 %v2822_v4, %v1434_v63  ;;  %v1401_v17 = vmax.f32 %v1365_v15, %v2694_v21  ;;  %v1368_v18 = vmax.f32 %v2696_v22, %v2179_v60 }
 0x120   :  { %v1439_v2 = vmax.f32 %v1403_v16, %v2250_v0  ;;  %v949_v6 = vpop.f32.mrf.mxu0  ;;  %v1237_v7 = vpop.f32.mrf.mxu1 }
 0x121   :  { %v1959_v62 = vpack.c.bf16 %v1515_v5, %v1514_v1  ;;  %v1513_v10 = vmax.f32 %v1477_v59, 0.0  ;;  %v1404_v20 = vmax.f32 %v1368_v18, %v2698_v23  ;;  %v1437_v19 = vmax.f32 %v1401_v17, %v1234_v13 }
 0x122   :  { %v1482_v58 = vadd.f32 %v2822_v4, %v1439_v2  ;;  %v1366_v57 = vmax.f32 %v2700_v24, %v949_v6  ;;  %v2182_v12 = vpop.f32.mrf.mxu0  ;;  %v2254_v8 = vpop.f32.mrf.mxu1 }
 0x123   :  { %2041 = vst [vmem:[%s2986_s3 + $0x8] sm:$0xff] %v1959_v62   ;;  %v1954_v21 = vpack.c.bf16 %v1513_v10, %v1512_v11  ;;  %v1440_v22 = vmax.f32 %v1404_v20, %v2251_v3  ;;  %v1371_v0 = vmax.f32 %v2704_v26, %v2182_v12  ;;  %v1480_v15 = vadd.f32 %v2822_v4, %v1437_v19 }
 0x124   :  { %v1402_v9 = vmax.f32 %v1366_v57, %v2702_v25  ;;  %v962_v14 = vpop.f32.mrf.mxu0  ;;  %v1250_v61 = vpop.f32.mrf.mxu1  ;;  %v1518_v63 = vmax.f32 %v1482_v58, 0.0 }
 0x125   :  { %1955 = vst [vmem:[%s2986_s3] sm:$0xff] %v1954_v21   ;;  %v1483_v23 = vadd.f32 %v2822_v4, %v1440_v22  ;;  %v1407_v24 = vmax.f32 %v1371_v0, %v2706_v27  ;;  %v1369_v13 = vmax.f32 %v2708_v28, %v962_v14  ;;  %v1516_v6 = vmax.f32 %v1480_v15, 0.0 }
 0x126   :  { %v1438_v1 = vmax.f32 %v1402_v9, %v1237_v7  ;;  %v2183_v16 = vpop.f32.mrf.mxu0  ;;  %v2255_v26 = vpop.f32.mrf.mxu1 }
 0x127   :  { %v1519_v60 = vmax.f32 %v1483_v23, 0.0  ;;  %v1443_v25 = vmax.f32 %v1407_v24, %v2254_v8  ;;  %v1405_v3 = vmax.f32 %v1369_v13, %v2710_v29  ;;  %v1372_v5 = vmax.f32 %v2712_v30, %v2183_v16 }
 0x128   :  { %v1481_v59 = vadd.f32 %v2822_v4, %v1438_v1  ;;  %v965_v17 = vpop.f32.mrf.mxu0  ;;  %v1253_v18 = vpop.f32.mrf.mxu1 }
 0x129   :  { %v1969_v2 = vpack.c.bf16 %v1519_v60, %v1518_v63  ;;  %v1441_v27 = vmax.f32 %v1405_v3, %v1250_v61  ;;  %v1408_v28 = vmax.f32 %v1372_v5, %v2714_v31  ;;  %v1486_v7 = vadd.f32 %v2822_v4, %v1443_v25 }
 0x12a   :  { %v1517_v11 = vmax.f32 %v1481_v59, 0.0  ;;  %v1370_v62 = vmax.f32 %v2716_v32, %v965_v17  ;;  %v2186_v10 = vpop.f32.mrf.mxu0  ;;  %v2258_v20 = vpop.f32.mrf.mxu1 }
 0x12b   :  { %2043 = vst [vmem:[%s2986_s3 + $0x18] sm:$0xff] %v1969_v2   ;;  %v1444_v29 = vmax.f32 %v1408_v28, %v2255_v26  ;;  %v1375_v30 = vmax.f32 %v2720_v34, %v2186_v10  ;;  %v1484_v12 = vadd.f32 %v2822_v4, %v1441_v27  ;;  %v1522_v22 = vmax.f32 %v1486_v7, 0.0 }
 0x12c   :  { %v1964_v58 = vpack.c.bf16 %v1517_v11, %v1516_v6  ;;  %v1406_v19 = vmax.f32 %v1370_v62, %v2718_v33  ;;  %v978_v57 = vpop.f32.mrf.mxu0  ;;  %v1266_v31 = vpop.f32.mrf.mxu1 }
 0x12d   :  { %v1487_v8 = vadd.f32 %v2822_v4, %v1444_v29  ;;  %v1411_v32 = vmax.f32 %v1375_v30, %v2722_v35  ;;  %v1373_v21 = vmax.f32 %v2724_v36, %v978_v57  ;;  %v1520_v63 = vmax.f32 %v1484_v12, 0.0 }
 0x12e   :  { %2042 = vst [vmem:[%s2986_s3 + $0x10] sm:$0xff] %v1964_v58   ;;  %v1442_v0 = vmax.f32 %v1406_v19, %v1253_v18  ;;  %v2187_v34 = vpop.f32.mrf.mxu0  ;;  %v2259_v9 = vpop.f32.mrf.mxu1 }
 0x12f   :  { %v1523_v14 = vmax.f32 %v1487_v8, 0.0  ;;  %v1447_v33 = vmax.f32 %v1411_v32, %v2258_v20  ;;  %v1409_v61 = vmax.f32 %v1373_v21, %v2726_v37  ;;  %v1376_v23 = vmax.f32 %v2728_v38, %v2187_v34 }
 0x130   :  { %v1485_v24 = vadd.f32 %v2822_v4, %v1442_v0  ;;  %v981_v13 = vpop.f32.mrf.mxu0  ;;  %v1269_v35 = vpop.f32.mrf.mxu1 }
 0x131   :  { %v1979_v36 = vpack.c.bf16 %v1523_v14, %v1522_v22  ;;  %v1412_v15 = vmax.f32 %v1376_v23, %v2730_v39  ;;  %v1490_v16 = vadd.f32 %v2822_v4, %v1447_v33  ;;  %v1445_v26 = vmax.f32 %v1409_v61, %v1266_v31 }
 0x132   :  { %v1521_v1 = vmax.f32 %v1485_v24, 0.0  ;;  %v1374_v60 = vmax.f32 %v2732_v40, %v981_v13  ;;  %v2190_v25 = vpop.f32.mrf.mxu0  ;;  %v2262_v3 = vpop.f32.mrf.mxu1 }
 0x133   :  { %2045 = vst [vmem:[%s2986_s3 + $0x28] sm:$0xff] %v1979_v36   ;;  %v1448_v37 = vmax.f32 %v1412_v15, %v2259_v9  ;;  %v1379_v38 = vmax.f32 %v2736_v42, %v2190_v25  ;;  %v1526_v27 = vmax.f32 %v1490_v16, 0.0  ;;  %v1488_v28 = vadd.f32 %v2822_v4, %v1445_v26 }
 0x134   :  { %v1974_v5 = vpack.c.bf16 %v1521_v1, %v1520_v63  ;;  %v1410_v59 = vmax.f32 %v1374_v60, %v2734_v41  ;;  %v994_v17 = vpop.f32.mrf.mxu0  ;;  %v1282_v39 = vpop.f32.mrf.mxu1 }
 0x135   :  { %v1491_v18 = vadd.f32 %v2822_v4, %v1448_v37  ;;  %v1415_v2 = vmax.f32 %v1379_v38, %v2738_v43  ;;  %v1377_v40 = vmax.f32 %v2740_v44, %v994_v17  ;;  %v1524_v19 = vmax.f32 %v1488_v28, 0.0 }
 0x136   :  { %2044 = vst [vmem:[%s2986_s3 + $0x20] sm:$0xff] %v1974_v5   ;;  %v1446_v6 = vmax.f32 %v1410_v59, %v1269_v35  ;;  %v2191_v42 = vpop.f32.mrf.mxu0  ;;  %v2263_v11 = vpop.f32.mrf.mxu1  ;;  %v3013_v59 = vld [vmem:[#allocation2_spill] sm:$0xff] }
 0x137   :  { %v1527_v7 = vmax.f32 %v1491_v18, 0.0  ;;  %v1451_v41 = vmax.f32 %v1415_v2, %v2262_v3  ;;  %v1413_v62 = vmax.f32 %v1377_v40, %v2742_v45  ;;  %v1380_v10 = vmax.f32 %v2744_v46, %v2191_v42  ;;  %v3014_v2 = vld [vmem:[#allocation4_spill] sm:$0xff] }
 0x138   :  { %v1489_v43 = vadd.f32 %v2822_v4, %v1446_v6  ;;  %v997_v20 = vpop.f32.mrf.mxu0  ;;  %v1285_v44 = vpop.f32.mrf.mxu1 }
 0x139   :  { %v1989_v29 = vpack.c.bf16 %v1527_v7, %v1526_v27  ;;  %v1449_v30 = vmax.f32 %v1413_v62, %v1282_v39  ;;  %v1416_v58 = vmax.f32 %v1380_v10, %v2746_v47  ;;  %v1494_v31 = vadd.f32 %v2822_v4, %v1451_v41  ;;  %v3015_v27 = vld [vmem:[#allocation5_spill] sm:$0xff]  ;;  %v3016_v10 = vld [vmem:[#allocation6_spill] sm:$0xff] }
 0x13a   :  { %v1525_v57 = vmax.f32 %v1489_v43, 0.0  ;;  %v1378_v12 = vmax.f32 %v2748_v48, %v997_v20  ;;  %v2194_v8 = vpop.f32.mrf.mxu0  ;;  %v2266_v32 = vpop.f32.mrf.mxu1  ;;  %v3017_v20 = vld [vmem:[#allocation7_spill] sm:$0xff] }
 0x13b   :  { %2047 = vst [vmem:[%s2986_s3 + $0x38] sm:$0xff] %v1989_v29   ;;  %v1452_v45 = vmax.f32 %v1416_v58, %v2263_v11  ;;  %v1383_v46 = vmax.f32 %v2752_v50, %v2194_v8  ;;  %v1492_v34 = vadd.f32 %v2822_v4, %v1449_v30  ;;  %v1530_v33 = vmax.f32 %v1494_v31, 0.0  ;;  %v3018_v31 = vld [vmem:[#allocation8_spill] sm:$0xff] }
 0x13c   :  { %v1984_v21 = vpack.c.bf16 %v1525_v57, %v1524_v19  ;;  %v1414_v22 = vmax.f32 %v1378_v12, %v2750_v49  ;;  %v1010_v0 = vpop.f32.mrf.mxu0  ;;  %v1298_v47 = vpop.f32.mrf.mxu1 }
 0x13d   :  { %v1495_v9 = vadd.f32 %v2822_v4, %v1452_v45  ;;  %v1419_v48 = vmax.f32 %v1383_v46, %v2754_v51  ;;  %v1381_v14 = vmax.f32 %v2756_v52, %v1010_v0  ;;  %v1528_v15 = vmax.f32 %v1492_v34, 0.0  ;;  %v3019_v46 = vld [vmem:[#allocation9_spill] sm:$0xff]  ;;  %v3020_v34 = vld [vmem:[#allocation11_spill] sm:$0xff] }
 0x13e   :  { %2046 = vst [vmem:[%s2986_s3 + $0x30] sm:$0xff] %v1984_v21   ;;  %v1450_v61 = vmax.f32 %v1414_v22, %v1285_v44  ;;  %v2195_v50 = vpop.f32.mrf.mxu0  ;;  %v2267_v23 = vpop.f32.mrf.mxu1 }
 0x13f   :  { %v1531_v24 = vmax.f32 %v1495_v9, 0.0  ;;  %v1455_v49 = vmax.f32 %v1419_v48, %v2266_v32  ;;  %v1417_v13 = vmax.f32 %v1381_v14, %v2758_v53  ;;  %v1384_v35 = vmax.f32 %v2760_v54, %v2195_v50  ;;  %v3012_v54 = vld [vmem:[#allocation3_spill] sm:$0xff]  ;;  %v3021_v14 = vld [vmem:[#allocation10_spill] sm:$0xff] }
 0x140   :  { %v1493_v63 = vadd.f32 %v2822_v4, %v1450_v61  ;;  %v1013_v36 = vpop.f32.mrf.mxu0  ;;  %v1301_v51 = vpop.f32.mrf.mxu1 }
 0x141   :  { %v1999_v52 = vpack.c.bf16 %v1531_v24, %v1530_v33  ;;  %v1420_v1 = vmax.f32 %v1384_v35, %v2762_v55  ;;  %v1498_v26 = vadd.f32 %v2822_v4, %v1455_v49  ;;  %v1453_v60 = vmax.f32 %v1417_v13, %v1298_v47  ;;  %v3022_v49 = vld [vmem:[#allocation12_spill] sm:$0xff]  ;;  %v3023_v35 = vld [vmem:[#allocation13_spill] sm:$0xff] }
 0x142   :  { %v1529_v16 = vmax.f32 %v1493_v63, 0.0  ;;  %v1382_v25 = vmax.f32 %v2764_v56, %v1013_v36  ;;  %v2198_v3 = vpop.f32.mrf.mxu0  ;;  %v2270_v37 = vpop.f32.mrf.mxu1 }
 0x143   :  { %2049 = vst [vmem:[%s2986_s3 + $0x48] sm:$0xff] %v1999_v52   ;;  %v1456_v53 = vmax.f32 %v1420_v1, %v2267_v23  ;;  %v1387_v38 = vmax.f32 %v3012_v54, %v2198_v3  ;;  %v1534_v28 = vmax.f32 %v1498_v26, 0.0  ;;  %v1496_v6 = vadd.f32 %v2822_v4, %v1453_v60  ;;  %v3024_v26 = vld [vmem:[#allocation14_spill] sm:$0xff] }
 0x144   :  { %v1994_v5 = vpack.c.bf16 %v1529_v16, %v1528_v15  ;;  %v1418_v17 = vmax.f32 %v1382_v25, %v3013_v59  ;;  %v1026_v39 = vpop.f32.mrf.mxu0  ;;  %v1314_v55 = vpop.f32.mrf.mxu1  ;;  %v3025_v25 = vld [vmem:[#allocation15_spill] sm:$0xff]  ;;  %v3026_v59 = vld [vmem:[#allocation16_spill] sm:$0xff] }
 0x145   :  { %v1499_v18 = vadd.f32 %v2822_v4, %v1456_v53  ;;  %v1423_v40 = vmax.f32 %v1387_v38, %v3014_v2  ;;  %v1385_v56 = vmax.f32 %v3015_v27, %v1026_v39  ;;  %v1532_v8 = vmax.f32 %v1496_v6, 0.0  ;;  %v3027_v2 = vld [vmem:[#allocation17_spill] sm:$0xff]  ;;  %v3028_v6 = vld [vmem:[#allocation19_spill] sm:$0xff] }
 0x146   :  { %2048 = vst [vmem:[%s2986_s3 + $0x40] sm:$0xff] %v1994_v5   ;;  %v1454_v42 = vmax.f32 %v1418_v17, %v1301_v51  ;;  %v2199_v11 = vpop.f32.mrf.mxu0  ;;  %v2271_v7 = vpop.f32.mrf.mxu1 }
 0x147   :  { %v1535_v41 = vmax.f32 %v1499_v18, 0.0  ;;  %v1459_v62 = vmax.f32 %v1423_v40, %v2270_v37  ;;  %v1421_v43 = vmax.f32 %v1385_v56, %v3016_v10  ;;  %v1388_v44 = vmax.f32 %v3017_v20, %v2199_v11 }
 0x148   :  { %v1497_v29 = vadd.f32 %v2822_v4, %v1454_v42  ;;  %v1029_v30 = vpop.f32.mrf.mxu0  ;;  %v1317_v58 = vpop.f32.mrf.mxu1 }
 0x149   :  { %v2009_v19 = vpack.c.bf16 %v1535_v41, %v1534_v28  ;;  %v1457_v57 = vmax.f32 %v1421_v43, %v1314_v55  ;;  %v1424_v12 = vmax.f32 %v1388_v44, %v3018_v31  ;;  %v1502_v45 = vadd.f32 %v2822_v4, %v1459_v62  ;;  %v3030_v43 = vld [vmem:[#allocation20_spill] sm:$0xff]  ;;  %v3031_v44 = vld [vmem:[#allocation21_spill] sm:$0xff] }
 0x14a   :  { %v1533_v32 = vmax.f32 %v1497_v29, 0.0  ;;  %v1386_v21 = vmax.f32 %v3019_v46, %v1029_v30  ;;  %v2202_v22 = vpop.f32.mrf.mxu0  ;;  %v2274_v0 = vpop.f32.mrf.mxu1  ;;  %v3033_v46 = vld [vmem:[#allocation23_spill] sm:$0xff] }
 0x14b   :  { %2051 = vst [vmem:[%s2986_s3 + $0x58] sm:$0xff] %v2009_v19   ;;  %v1460_v47 = vmax.f32 %v1424_v12, %v2271_v7  ;;  %v1391_v9 = vmax.f32 %v3020_v34, %v2202_v22  ;;  %v1500_v23 = vadd.f32 %v2822_v4, %v1457_v57  ;;  %v1538_v36 = vmax.f32 %v1502_v45, 0.0  ;;  %v3029_v7 = vld [vmem:[#allocation18_spill] sm:$0xff] }
 0x14c   :  { %v2004_v48 = vpack.c.bf16 %v1533_v32, %v1532_v8  ;;  %v1422_v33 = vmax.f32 %v1386_v21, %v3021_v14  ;;  %v1042_v61 = vpop.f32.mrf.mxu0  ;;  %v1330_v50 = vpop.f32.mrf.mxu1  ;;  %v3032_v32 = vld [vmem:[#allocation22_spill] sm:$0xff] }
 0x14d   :  { %v1503_v24 = vadd.f32 %v2822_v4, %v1460_v47  ;;  %v1427_v13 = vmax.f32 %v1391_v9, %v3022_v49  ;;  %v1389_v63 = vmax.f32 %v3023_v35, %v1042_v61  ;;  %v1536_v38 = vmax.f32 %v1500_v23, 0.0  ;;  %v3034_v9 = vld [vmem:[#allocation24_spill] sm:$0xff]  ;;  %v3036_v35 = vld [vmem:[#allocation26_spill] sm:$0xff] }
 0x14e   :  { %2050 = vst [vmem:[%s2986_s3 + $0x50] sm:$0xff] %v2004_v48   ;;  %v1458_v51 = vmax.f32 %v1422_v33, %v1317_v58  ;;  %v2203_v15 = vpop.f32.mrf.mxu0  ;;  %v2275_v52 = vpop.f32.mrf.mxu1 }
 0x14f   :  { %v1539_v1 = vmax.f32 %v1503_v24, 0.0  ;;  %v1463_v16 = vmax.f32 %v1427_v13, %v2274_v0  ;;  %v1425_v60 = vmax.f32 %v1389_v63, %v3024_v26  ;;  %v1392_v3 = vmax.f32 %v3025_v25, %v2203_v15 }
 0x150   :  { %v1501_v37 = vadd.f32 %v2822_v4, %v1458_v51  ;;  %v1045_v53 = vpop.f32.mrf.mxu0  ;;  %v1333_v54 = vpop.f32.mrf.mxu1 }
 0x151   :  { %v2019_v5 = vpack.c.bf16 %v1539_v1, %v1538_v36  ;;  %v1428_v17 = vmax.f32 %v1392_v3, %v3026_v59  ;;  %v1506_v55 = vadd.f32 %v2822_v4, %v1463_v16  ;;  %v1461_v18 = vmax.f32 %v1425_v60, %v1330_v50  ;;  %v3035_v50 = vld [vmem:[#allocation25_spill] sm:$0xff] }
 0x152   :  { %v1537_v39 = vmax.f32 %v1501_v37, 0.0  ;;  %v1390_v40 = vmax.f32 %v3027_v2, %v1045_v53  ;;  %v2206_v27 = vpop.f32.mrf.mxu0  ;;  %v2278_v56 = vpop.f32.mrf.mxu1 }
 0x153   :  { %2053 = vst [vmem:[%s2986_s3 + $0x68] sm:$0xff] %v2019_v5   ;;  %v1464_v28 = vmax.f32 %v1428_v17, %v2275_v52  ;;  %v1395_v42 = vmax.f32 %v3028_v6, %v2206_v27  ;;  %v1542_v58 = vmax.f32 %v1506_v55, 0.0  ;;  %v1504_v19 = vadd.f32 %v2822_v4, %v1461_v18 }
 0x154   :  { %v2014_v11 = vpack.c.bf16 %v1537_v39, %v1536_v38  ;;  %v1426_v41 = vmax.f32 %v1390_v40, %v3029_v7  ;;  %v1058_v62 = vpop.f32.mrf.mxu0  ;;  %v1346_v30 = vpop.f32.mrf.mxu1 }
 0x155   :  { %v1507_v10 = vadd.f32 %v2822_v4, %v1464_v28  ;;  %v1431_v20 = vmax.f32 %v1395_v42, %v3030_v43  ;;  %v1393_v29 = vmax.f32 %v3031_v44, %v1058_v62  ;;  %v1540_v14 = vmax.f32 %v1504_v19, 0.0 }
 0x156   :  { %2052 = vst [vmem:[%s2986_s3 + $0x60] sm:$0xff] %v2014_v11   ;;  %v1462_v57 = vmax.f32 %v1426_v41, %v1333_v54  ;;  %v2207_v31 = vpop.f32.mrf.mxu0  ;;  %v2279_v34 = vpop.f32.mrf.mxu1 }
 0x157   :  { %v1543_v12 = vmax.f32 %v1507_v10, 0.0  ;;  %v1467_v8 = vmax.f32 %v1431_v20, %v2278_v56  ;;  %v1429_v45 = vmax.f32 %v1393_v29, %v3032_v32  ;;  %v1396_v21 = vmax.f32 %v3033_v46, %v2207_v31 }
 0x158   :  { %v1505_v22 = vadd.f32 %v2822_v4, %v1462_v57  ;;  %v1061_v0 = vpop.f32.mrf.mxu0  ;;  %v1349_v51 = vpop.f32.mrf.mxu1 }
 0x159   :  { %v2029_v47 = vpack.c.bf16 %v1543_v12, %v1542_v58  ;;  %v1432_v48 = vmax.f32 %v1396_v21, %v3034_v9  ;;  %v1465_v61 = vmax.f32 %v1429_v45, %v1346_v30  ;;  %v1394_v23 = vmax.f32 %v3035_v50, %v1061_v0 }
 0x15a   :  { %v1541_v33 = vmax.f32 %v1505_v22, 0.0  ;;  %v1510_v24 = vadd.f32 %v2822_v4, %v1467_v8 }
 0x15b   :  { %2055 = vst [vmem:[%s2986_s3 + $0x78] sm:$0xff] %v2029_v47   ;;  %v1468_v49 = vmax.f32 %v1432_v48, %v2279_v34  ;;  %v1430_v63 = vmax.f32 %v1394_v23, %v3036_v35  ;;  %v1508_v15 = vadd.f32 %v2822_v4, %v1465_v61 }
 0x15c   :  { %v2024_v13 = vpack.c.bf16 %v1541_v33, %v1540_v14  ;;  %v1546_v1 = vmax.f32 %v1510_v24, 0.0 }
 0x15d   :  { %v1511_v36 = vadd.f32 %v2822_v4, %v1468_v49  ;;  %v1466_v52 = vmax.f32 %v1430_v63, %v1349_v51  ;;  %v1544_v25 = vmax.f32 %v1508_v15, 0.0 }
 0x15e   :  { %2054 = vst [vmem:[%s2986_s3 + $0x70] sm:$0xff] %v2024_v13  }
 0x15f   :  { %v1547_v16 = vmax.f32 %v1511_v36, 0.0  ;;  %v1509_v26 = vadd.f32 %v2822_v4, %v1466_v52 }
 0x161   :  { %v2039_v60 = vpack.c.bf16 %v1547_v16, %v1546_v1  ;;  %v1545_v3 = vmax.f32 %v1509_v26, 0.0 }
 0x163   :  { %2057 = vst [vmem:[%s2986_s3 + $0x88] sm:$0xff] %v2039_v60   ;;  %v2034_v37 = vpack.c.bf16 %v1545_v3, %v1544_v25 }
 0x165   :  { %2056 = vst [vmem:[%s2986_s3 + $0x80] sm:$0xff] %v2034_v37  }

// kernel: net_forward.4
= control target key start
LH: loop header
LB: loop body
LE: loop exit
PB: predicated region body
PF: predicated region fallthrough
CT: control target
= control target key end

     0   :  { %s684_s1 = inlined_call_operand.vmem [shape: bf16[256,128], index: 1, kind: input, shape index: {}]   ;;  %s685_s0 = inlined_call_operand.vmem [shape: bf16[4,32,256], index: 0, kind: input, shape index: {}]   ;;  %s686_s2 = inlined_call_operand.vmem [shape: f32[1,128], index: 2, kind: input, shape index: {}]   ;;  %s687_s3 = inlined_call_operand.vmem [shape: bf16[32,128], index: 3, kind: output, shape index: {}]  }
   0x1   :  { %v519_v0 = vld [vmem:[%s684_s1 + $0x78] sm:$0xff]   ;;  %v521_v2 = vld [vmem:[%s684_s1 + $0x70] sm:$0xff]   ;;  %v523_v4 = vld [vmem:[%s684_s1 + $0x68] sm:$0xff]  }
   0x2   :  { %v520_v1 = vld [vmem:[%s684_s1 + $0x38] sm:$0xff]   ;;  %439 = vmatprep.subr.bf16.mxu0 %v519_v0  ;;  %503 = vmatprep.subr.bf16.mxu1 %v519_v0  ;;  %v522_v3 = vld [vmem:[%s684_s1 + $0x30] sm:$0xff]   ;;  %v524_v5 = vld [vmem:[%s684_s1 + $0x28] sm:$0xff]  }
   0x3   :  { %440 = vmatpush3.bf16.msra.mxu0 %v520_v1  ;;  %511 = vmatpush3.bf16.msra.mxu1 %v520_v1  ;;  %v525_v6 = vld [vmem:[%s684_s1 + $0x60] sm:$0xff]   ;;  %v527_v8 = vld [vmem:[%s684_s1 + $0x58] sm:$0xff]   ;;  %v529_v10 = vld [vmem:[%s684_s1 + $0x50] sm:$0xff]  }
   0x4   :  { %441 = vmatprep.subr.bf16.mxu0 %v521_v2  ;;  %504 = vmatprep.subr.bf16.mxu1 %v521_v2  ;;  %v526_v7 = vld [vmem:[%s684_s1 + $0x20] sm:$0xff]   ;;  %v528_v9 = vld [vmem:[%s684_s1 + $0x18] sm:$0xff]   ;;  %v530_v13 = vld [vmem:[%s684_s1 + $0x10] sm:$0xff]  }
   0x5   :  { %v537_v11 = vld [vmem:[%s685_s0 + $0x4] ss:$8 sps:$4 sm:$0xff]   ;;  %v535_v18 = vld [vmem:[%s685_s0] ss:$8 sps:$4 sm:$0xff]   ;;  %v541_v20 = vld [vmem:[%s685_s0 + $0x14] ss:$8 sps:$4 sm:$0xff]  }
   0x6   :  { %v540_v12 = vld [vmem:[%s685_s0 + $0x44] ss:$8 sps:$4 sm:$0xff]   ;;  %271 = vmatprep.mubr.bf16.mxu0 %v537_v11  ;;  %v538_v19 = vld [vmem:[%s685_s0 + $0x40] ss:$8 sps:$4 sm:$0xff]   ;;  %v543_v21 = vld [vmem:[%s685_s0 + $0x54] ss:$8 sps:$4 sm:$0xff]  }
   0x7   :  { %442 = vmatpush3.bf16.msra.mxu0 %v522_v3  ;;  %512 = vmatpush3.bf16.msra.mxu1 %v522_v3  ;;  %v531_v14 = vld [vmem:[%s684_s1 + $0x48] sm:$0xff]   ;;  %v533_v16 = vld [vmem:[%s684_s1 + $0x40] sm:$0xff]   ;;  %v545_v22 = vld [vmem:[%s685_s0 + $0x10] ss:$8 sps:$4 sm:$0xff]  }
   0x8   :  { %443 = vmatprep.subr.bf16.mxu0 %v523_v4  ;;  %505 = vmatprep.subr.bf16.mxu1 %v523_v4  ;;  %v532_v15 = vld [vmem:[%s684_s1 + $0x8] sm:$0xff]   ;;  %v534_v17 = vld [vmem:[%s684_s1] sm:$0xff]   ;;  %v546_v23 = vld [vmem:[%s685_s0 + $0x50] ss:$8 sps:$4 sm:$0xff]  }
   0x9   :  { %303 = vmatprep.mubr.bf16.mxu1 %v540_v12  ;;  %v547_v24 = vld [vmem:[%s685_s0 + $0x24] ss:$8 sps:$4 sm:$0xff]   ;;  %v551_v26 = vld [vmem:[%s685_s0 + $0x20] ss:$8 sps:$4 sm:$0xff]   ;;  %v553_v28 = vld [vmem:[%s685_s0 + $0x34] ss:$8 sps:$4 sm:$0xff]  }
   0xa   :  { %v549_v25 = vld [vmem:[%s685_s0 + $0x64] ss:$8 sps:$4 sm:$0xff]   ;;  %v552_v27 = vld [vmem:[%s685_s0 + $0x60] ss:$8 sps:$4 sm:$0xff]   ;;  %v555_v29 = vld [vmem:[%s685_s0 + $0x74] ss:$8 sps:$4 sm:$0xff]  }
   0xb   :  { %444 = vmatpush3.bf16.msra.mxu0 %v524_v5  ;;  %513 = vmatpush3.bf16.msra.mxu1 %v524_v5  ;;  %v557_v30 = vld [vmem:[%s685_s0 + $0x30] ss:$8 sps:$4 sm:$0xff]   ;;  %v419_v5 = vld [vmem:[%s686_s2] ss:$0 sm:$0xff] }
   0xc   :  { %445 = vmatprep.subr.bf16.mxu0 %v525_v6  ;;  %506 = vmatprep.subr.bf16.mxu1 %v525_v6  ;;  %v558_v31 = vld [vmem:[%s685_s0 + $0x70] ss:$8 sps:$4 sm:$0xff]  }
   0xf   :  { %446 = vmatpush3.bf16.msra.mxu0 %v526_v7  ;;  %514 = vmatpush3.bf16.msra.mxu1 %v526_v7 }
  0x10   :  { %447 = vmatprep.subr.bf16.mxu0 %v527_v8  ;;  %507 = vmatprep.subr.bf16.mxu1 %v527_v8 }
  0x13   :  { %448 = vmatpush3.bf16.msra.mxu0 %v528_v9  ;;  %515 = vmatpush3.bf16.msra.mxu1 %v528_v9 }
  0x14   :  { %449 = vmatprep.subr.bf16.mxu0 %v529_v10  ;;  %508 = vmatprep.subr.bf16.mxu1 %v529_v10 }
  0x17   :  { %450 = vmatpush3.bf16.msra.mxu0 %v530_v13  ;;  %516 = vmatpush3.bf16.msra.mxu1 %v530_v13 }
  0x18   :  { %451 = vmatprep.subr.bf16.mxu0 %v531_v14  ;;  %509 = vmatprep.subr.bf16.mxu1 %v531_v14 }
  0x1b   :  { %452 = vmatpush3.bf16.msra.mxu0 %v532_v15  ;;  %517 = vmatpush3.bf16.msra.mxu1 %v532_v15 }
  0x1c   :  { %453 = vmatprep.subr.bf16.mxu0 %v533_v16  ;;  %510 = vmatprep.subr.bf16.mxu1 %v533_v16 }
  0x1f   :  { %454 = vmatpush3.bf16.msra.mxu0 %v534_v17  ;;  %518 = vmatpush3.bf16.msra.mxu1 %v534_v17 }
  0x22   :  { %272 = vmatmul.mubr.bf16.vlgmr.msra.gmra.mxu0 %v535_v18  ;;  %304 = vmatmul.mubr.bf16.vlgmr.msra.gmra.mxu1 %v538_v19 }
  0x23   :  { %279 = vmatprep.mubr.bf16.mxu0 %v541_v20  ;;  %311 = vmatprep.mubr.bf16.mxu1 %v543_v21 }
  0x2a   :  { %280 = vmatmul.mubr.bf16.gmra.mxu0 %v545_v22  ;;  %312 = vmatmul.mubr.bf16.gmra.mxu1 %v546_v23 }
  0x2b   :  { %287 = vmatprep.mubr.bf16.mxu0 %v547_v24  ;;  %319 = vmatprep.mubr.bf16.mxu1 %v549_v25 }
  0x32   :  { %288 = vmatmul.mubr.bf16.gmra.mxu0 %v551_v26  ;;  %320 = vmatmul.mubr.bf16.gmra.mxu1 %v552_v27 }
  0x33   :  { %295 = vmatprep.mubr.bf16.mxu0 %v553_v28  ;;  %327 = vmatprep.mubr.bf16.mxu1 %v555_v29 }
  0x3a   :  { %296 = vmatmul.mubr.bf16.gmra.mxu0 %v557_v30  ;;  %328 = vmatmul.mubr.bf16.gmra.mxu1 %v558_v31 }
  0xe2   :  { %v455_v32 = vpop.f32.mrf.mxu0  ;;  %v479_v33 = vpop.f32.mrf.mxu1 }
  0xe4   :  { %v456_v34 = vpop.f32.mrf.mxu0  ;;  %v480_v35 = vpop.f32.mrf.mxu1 }
  0xe5   :  { %v457_v52 = vadd.f32 %v456_v34, %v455_v32  ;;  %v481_v56 = vadd.f32 %v480_v35, %v479_v33 }
  0xe6   :  { %v458_v36 = vpop.f32.mrf.mxu0  ;;  %v482_v37 = vpop.f32.mrf.mxu1 }
  0xe8   :  { %v459_v38 = vpop.f32.mrf.mxu0  ;;  %v483_v39 = vpop.f32.mrf.mxu1 }
  0xe9   :  { %v460_v60 = vadd.f32 %v459_v38, %v458_v36  ;;  %v484_v2 = vadd.f32 %v483_v39, %v482_v37 }
  0xea   :  { %v461_v40 = vpop.f32.mrf.mxu0  ;;  %v485_v41 = vpop.f32.mrf.mxu1 }
  0xec   :  { %v462_v42 = vpop.f32.mrf.mxu0  ;;  %v486_v43 = vpop.f32.mrf.mxu1 }
  0xed   :  { %v463_v8 = vadd.f32 %v462_v42, %v461_v40  ;;  %v487_v14 = vadd.f32 %v486_v43, %v485_v41 }
  0xee   :  { %v464_v44 = vpop.f32.mrf.mxu0  ;;  %v488_v45 = vpop.f32.mrf.mxu1 }
  0xf0   :  { %v465_v46 = vpop.f32.mrf.mxu0  ;;  %v489_v47 = vpop.f32.mrf.mxu1 }
  0xf1   :  { %v466_v18 = vadd.f32 %v465_v46, %v464_v44  ;;  %v490_v24 = vadd.f32 %v489_v47, %v488_v45 }
  0xf2   :  { %v467_v48 = vpop.f32.mrf.mxu0  ;;  %v491_v49 = vpop.f32.mrf.mxu1 }
  0xf4   :  { %v468_v50 = vpop.f32.mrf.mxu0  ;;  %v492_v51 = vpop.f32.mrf.mxu1 }
  0xf5   :  { %v469_v53 = vadd.f32 %v468_v50, %v467_v48  ;;  %v493_v61 = vadd.f32 %v492_v51, %v491_v49 }
  0xf6   :  { %v470_v54 = vpop.f32.mrf.mxu0  ;;  %v494_v55 = vpop.f32.mrf.mxu1 }
  0xf7   :  { %v336_v57 = vmax.f32 %v457_v52, %v469_v53 }
  0xf8   :  { %v471_v58 = vpop.f32.mrf.mxu0  ;;  %v495_v59 = vpop.f32.mrf.mxu1 }
  0xf9   :  { %v340_v62 = vmax.f32 %v336_v57, %v481_v56  ;;  %v472_v63 = vadd.f32 %v471_v58, %v470_v54  ;;  %v496_v9 = vadd.f32 %v495_v59, %v494_v55 }
  0xfa   :  { %v473_v0 = vpop.f32.mrf.mxu0  ;;  %v497_v1 = vpop.f32.mrf.mxu1 }
  0xfb   :  { %v344_v3 = vmax.f32 %v340_v62, %v493_v61  ;;  %v337_v4 = vmax.f32 %v460_v60, %v472_v63 }
  0xfc   :  { %v474_v6 = vpop.f32.mrf.mxu0  ;;  %v498_v7 = vpop.f32.mrf.mxu1 }
  0xfd   :  { %v341_v10 = vmax.f32 %v337_v4, %v484_v2  ;;  %v475_v11 = vadd.f32 %v474_v6, %v473_v0  ;;  %v355_v15 = vadd.f32 %v419_v5, %v344_v3  ;;  %v499_v21 = vadd.f32 %v498_v7, %v497_v1 }
  0xfe   :  { %v476_v12 = vpop.f32.mrf.mxu0  ;;  %v500_v13 = vpop.f32.mrf.mxu1 }
  0xff   :  { %v345_v16 = vmax.f32 %v341_v10, %v496_v9  ;;  %v338_v17 = vmax.f32 %v463_v8, %v475_v11  ;;  %v359_v26 = vmax.f32 %v355_v15, 0.0 }
 0x100   :  { %v477_v19 = vpop.f32.mrf.mxu0  ;;  %v501_v25 = vpop.f32.mrf.mxu1 }
 0x101   :  { %v356_v20 = vadd.f32 %v419_v5, %v345_v16  ;;  %v342_v22 = vmax.f32 %v338_v17, %v487_v14  ;;  %v478_v23 = vadd.f32 %v477_v19, %v476_v12  ;;  %v502_v31 = vadd.f32 %v501_v25, %v500_v13 }
 0x103   :  { %v360_v27 = vmax.f32 %v356_v20, 0.0  ;;  %v346_v28 = vmax.f32 %v342_v22, %v499_v21  ;;  %v339_v29 = vmax.f32 %v466_v18, %v478_v23 }
 0x105   :  { %v431_v30 = vpack.c.bf16 %v360_v27, %v359_v26  ;;  %v343_v32 = vmax.f32 %v339_v29, %v490_v24  ;;  %v357_v33 = vadd.f32 %v419_v5, %v346_v28 }
 0x107   :  { %432 = vst [vmem:[%s687_s3] sm:$0xff] %v431_v30   ;;  %v347_v34 = vmax.f32 %v343_v32, %v502_v31  ;;  %v361_v36 = vmax.f32 %v357_v33, 0.0 }
 0x109   :  { %v358_v35 = vadd.f32 %v419_v5, %v347_v34 }
 0x10b   :  { %v362_v37 = vmax.f32 %v358_v35, 0.0 }
 0x10d   :  { %v436_v38 = vpack.c.bf16 %v362_v37, %v361_v36 }
 0x10f   :  { %438 = vst [vmem:[%s687_s3 + $0x8] sm:$0xff] %v436_v38  }

// kernel: net_forward.5
= control target key start
LH: loop header
LB: loop body
LE: loop exit
PB: predicated region body
PF: predicated region fallthrough
CT: control target
= control target key end

     0   :  { %s2386_s1 = inlined_call_operand.vmem [shape: bf16[2048,128], index: 1, kind: input, shape index: {}]   ;;  %s2387_s0 = inlined_call_operand.vmem [shape: bf16[16,2048], index: 0, kind: input, shape index: {}]   ;;  %s2388_s2 = inlined_call_operand.vmem [shape: f32[1,128], index: 2, kind: input, shape index: {}]   ;;  %s2389_s3 = inlined_call_operand.vmem [shape: f32[16,128], index: 3, kind: output, shape index: {}]  }
   0x1   :  { %v1797_v0 = vld [vmem:[%s2386_s1 + $0x78] sm:$0xff]   ;;  %v1801_v4 = vld [vmem:[%s2386_s1 + $0x70] sm:$0xff]   ;;  %v1805_v8 = vld [vmem:[%s2386_s1 + $0x68] sm:$0xff]  }
   0x2   :  { %v1798_v1 = vld [vmem:[%s2386_s1 + $0xf8] sm:$0xff]   ;;  %1621 = vmatprep.subr.bf16.mxu0 %v1797_v0  ;;  %v1802_v5 = vld [vmem:[%s2386_s1 + $0xf0] sm:$0xff]   ;;  %v1806_v9 = vld [vmem:[%s2386_s1 + $0xe8] sm:$0xff]  }
   0x3   :  { %v1799_v2 = vld [vmem:[%s2386_s1 + $0x38] sm:$0xff]   ;;  %1643 = vmatprep.subr.bf16.mxu1 %v1798_v1  ;;  %v1803_v6 = vld [vmem:[%s2386_s1 + $0x30] sm:$0xff]   ;;  %v1807_v10 = vld [vmem:[%s2386_s1 + $0x28] sm:$0xff]  }
   0x4   :  { %v1800_v3 = vld [vmem:[%s2386_s1 + $0xb8] sm:$0xff]   ;;  %1622 = vmatpush3.bf16.msra.mxu0 %v1799_v2  ;;  %v1804_v7 = vld [vmem:[%s2386_s1 + $0xb0] sm:$0xff]   ;;  %v1808_v11 = vld [vmem:[%s2386_s1 + $0xa8] sm:$0xff]  }
   0x5   :  { %1644 = vmatpush3.bf16.msra.mxu1 %v1800_v3  ;;  %1623 = vmatprep.subr.bf16.mxu0 %v1801_v4  ;;  %v1809_v12 = vld [vmem:[%s2386_s1 + $0x60] sm:$0xff]   ;;  %v1813_v16 = vld [vmem:[%s2386_s1 + $0x58] sm:$0xff]   ;;  %v1817_v20 = vld [vmem:[%s2386_s1 + $0x50] sm:$0xff]  }
   0x6   :  { %1645 = vmatprep.subr.bf16.mxu1 %v1802_v5  ;;  %v1810_v13 = vld [vmem:[%s2386_s1 + $0xe0] sm:$0xff]   ;;  %v1814_v17 = vld [vmem:[%s2386_s1 + $0xd8] sm:$0xff]   ;;  %v1818_v21 = vld [vmem:[%s2386_s1 + $0xd0] sm:$0xff]  }
   0x7   :  { %v1811_v14 = vld [vmem:[%s2386_s1 + $0x20] sm:$0xff]   ;;  %v1815_v18 = vld [vmem:[%s2386_s1 + $0x18] sm:$0xff]   ;;  %v1819_v22 = vld [vmem:[%s2386_s1 + $0x10] sm:$0xff]  }
   0x8   :  { %1624 = vmatpush3.bf16.msra.mxu0 %v1803_v6  ;;  %v1812_v15 = vld [vmem:[%s2386_s1 + $0xa0] sm:$0xff]   ;;  %v1816_v19 = vld [vmem:[%s2386_s1 + $0x98] sm:$0xff]   ;;  %v1820_v23 = vld [vmem:[%s2386_s1 + $0x90] sm:$0xff]  }
   0x9   :  { %1646 = vmatpush3.bf16.msra.mxu1 %v1804_v7  ;;  %1625 = vmatprep.subr.bf16.mxu0 %v1805_v8  ;;  %v1821_v24 = vld [vmem:[%s2386_s1 + $0x48] sm:$0xff]   ;;  %v1825_v28 = vld [vmem:[%s2386_s1 + $0x40] sm:$0xff]   ;;  %v1829_v40 = vld [vmem:[%s2386_s1 + $0x178] sm:$0xff]  }
   0xa   :  { %1647 = vmatprep.subr.bf16.mxu1 %v1806_v9  ;;  %v1822_v25 = vld [vmem:[%s2386_s1 + $0xc8] sm:$0xff]   ;;  %v1826_v29 = vld [vmem:[%s2386_s1 + $0xc0] sm:$0xff]   ;;  %v1830_v41 = vld [vmem:[%s2386_s1 + $0x1f8] sm:$0xff]  }
   0xb   :  { %v1823_v26 = vld [vmem:[%s2386_s1 + $0x8] sm:$0xff]   ;;  %v1827_v30 = vld [vmem:[%s2386_s1] sm:$0xff]   ;;  %v1831_v42 = vld [vmem:[%s2386_s1 + $0x138] sm:$0xff]  }
   0xc   :  { %1626 = vmatpush3.bf16.msra.mxu0 %v1807_v10  ;;  %v1824_v27 = vld [vmem:[%s2386_s1 + $0x88] sm:$0xff]   ;;  %v1828_v31 = vld [vmem:[%s2386_s1 + $0x80] sm:$0xff]   ;;  %v1832_v43 = vld [vmem:[%s2386_s1 + $0x1b8] sm:$0xff]  }
   0xd   :  { %1648 = vmatpush3.bf16.msra.mxu1 %v1808_v11  ;;  %1627 = vmatprep.subr.bf16.mxu0 %v1809_v12  ;;  %v15_v32 = vld [vmem:[%s2387_s0] sm:$0xff]  ;;  %v16_v34 = vld [vmem:[%s2387_s0 + $0x8] sm:$0xff]  ;;  %v1833_v44 = vld [vmem:[%s2386_s1 + $0x170] sm:$0xff]  }
   0xe   :  { %1649 = vmatprep.subr.bf16.mxu1 %v1810_v13  ;;  %v23_v33 = vld [vmem:[%s2387_s0 + $0x40] sm:$0xff]  ;;  %v24_v37 = vld [vmem:[%s2387_s0 + $0x48] sm:$0xff]  ;;  %v1834_v45 = vld [vmem:[%s2386_s1 + $0x1f0] sm:$0xff]  }
   0xf   :  { %v1477_v35 = vcombine.low %v15_v32, %v23_v33  ;;  %v1478_v36 = vcombine.high %v15_v32, %v23_v33  ;;  %v1479_v38 = vcombine.low %v16_v34, %v24_v37  ;;  %v1480_v39 = vcombine.high %v16_v34, %v24_v37  ;;  %v1835_v46 = vld [vmem:[%s2386_s1 + $0x130] sm:$0xff]   ;;  %v1837_v48 = vld [vmem:[%s2386_s1 + $0x168] sm:$0xff]   ;;  %v1841_v52 = vld [vmem:[%s2386_s1 + $0x160] sm:$0xff]  }
  0x10   :  { %1628 = vmatpush3.bf16.msra.mxu0 %v1811_v14  ;;  %v1836_v47 = vld [vmem:[%s2386_s1 + $0x1b0] sm:$0xff]   ;;  %v1838_v49 = vld [vmem:[%s2386_s1 + $0x1e8] sm:$0xff]   ;;  %v1842_v53 = vld [vmem:[%s2386_s1 + $0x1e0] sm:$0xff]  }
  0x11   :  { %1650 = vmatpush3.bf16.msra.mxu1 %v1812_v15  ;;  %1629 = vmatprep.subr.bf16.mxu0 %v1813_v16  ;;  %v1839_v50 = vld [vmem:[%s2386_s1 + $0x128] sm:$0xff]   ;;  %v1843_v54 = vld [vmem:[%s2386_s1 + $0x120] sm:$0xff]   ;;  %v1845_v56 = vld [vmem:[%s2386_s1 + $0x158] sm:$0xff]  }
  0x12   :  { %1651 = vmatprep.subr.bf16.mxu1 %v1814_v17  ;;  %1174 = vmatprep.mubr.bf16.mxu0 %v1478_v36  ;;  %v1840_v51 = vld [vmem:[%s2386_s1 + $0x1a8] sm:$0xff]   ;;  %v1844_v55 = vld [vmem:[%s2386_s1 + $0x1a0] sm:$0xff]   ;;  %v1846_v57 = vld [vmem:[%s2386_s1 + $0x1d8] sm:$0xff]  }
  0x13   :  { %1215 = vmatprep.mubr.bf16.mxu1 %v1480_v39  ;;  %v1847_v58 = vld [vmem:[%s2386_s1 + $0x118] sm:$0xff]   ;;  %v1849_v60 = vld [vmem:[%s2386_s1 + $0x150] sm:$0xff]   ;;  %v1853_v0 = vld [vmem:[%s2386_s1 + $0x148] sm:$0xff]  }
  0x14   :  { %1630 = vmatpush3.bf16.msra.mxu0 %v1815_v18  ;;  %v1848_v59 = vld [vmem:[%s2386_s1 + $0x198] sm:$0xff]   ;;  %v1850_v61 = vld [vmem:[%s2386_s1 + $0x1d0] sm:$0xff]   ;;  %v1854_v1 = vld [vmem:[%s2386_s1 + $0x1c8] sm:$0xff]  }
  0x15   :  { %1652 = vmatpush3.bf16.msra.mxu1 %v1816_v19  ;;  %1631 = vmatprep.subr.bf16.mxu0 %v1817_v20  ;;  %v1851_v62 = vld [vmem:[%s2386_s1 + $0x110] sm:$0xff]   ;;  %v1855_v2 = vld [vmem:[%s2386_s1 + $0x108] sm:$0xff]   ;;  %v1857_v4 = vld [vmem:[%s2386_s1 + $0x140] sm:$0xff]  }
  0x16   :  { %1653 = vmatprep.subr.bf16.mxu1 %v1818_v21  ;;  %v1852_v63 = vld [vmem:[%s2386_s1 + $0x190] sm:$0xff]   ;;  %v1856_v3 = vld [vmem:[%s2386_s1 + $0x188] sm:$0xff]   ;;  %v1858_v5 = vld [vmem:[%s2386_s1 + $0x1c0] sm:$0xff]  }
  0x17   :  { %v1859_v6 = vld [vmem:[%s2386_s1 + $0x100] sm:$0xff]   ;;  %v17_v8 = vld [vmem:[%s2387_s0 + $0x10] sm:$0xff]  ;;  %v18_v12 = vld [vmem:[%s2387_s0 + $0x18] sm:$0xff] }
  0x18   :  { %1632 = vmatpush3.bf16.msra.mxu0 %v1819_v22  ;;  %v1860_v7 = vld [vmem:[%s2386_s1 + $0x180] sm:$0xff]   ;;  %v25_v9 = vld [vmem:[%s2387_s0 + $0x50] sm:$0xff]  ;;  %v26_v13 = vld [vmem:[%s2387_s0 + $0x58] sm:$0xff] }
  0x19   :  { %1654 = vmatpush3.bf16.msra.mxu1 %v1820_v23  ;;  %1633 = vmatprep.subr.bf16.mxu0 %v1821_v24  ;;  %v1481_v10 = vcombine.low %v17_v8, %v25_v9  ;;  %v1482_v11 = vcombine.high %v17_v8, %v25_v9  ;;  %v1483_v14 = vcombine.low %v18_v12, %v26_v13  ;;  %v1861_v16 = vld [vmem:[%s2386_s1 + $0x278] sm:$0xff]   ;;  %v1865_v20 = vld [vmem:[%s2386_s1 + $0x270] sm:$0xff]   ;;  %v1869_v24 = vld [vmem:[%s2386_s1 + $0x268] sm:$0xff]  }
  0x1a   :  { %1655 = vmatprep.subr.bf16.mxu1 %v1822_v25  ;;  %v1484_v15 = vcombine.high %v18_v12, %v26_v13  ;;  %v1862_v17 = vld [vmem:[%s2386_s1 + $0x2f8] sm:$0xff]   ;;  %v1866_v21 = vld [vmem:[%s2386_s1 + $0x2f0] sm:$0xff]   ;;  %v1870_v25 = vld [vmem:[%s2386_s1 + $0x2e8] sm:$0xff]  }
  0x1b   :  { %v1863_v18 = vld [vmem:[%s2386_s1 + $0x238] sm:$0xff]   ;;  %v1867_v22 = vld [vmem:[%s2386_s1 + $0x230] sm:$0xff]  }
  0x1c   :  { %1634 = vmatpush3.bf16.msra.mxu0 %v1823_v26  ;;  %v1864_v19 = vld [vmem:[%s2386_s1 + $0x2b8] sm:$0xff]   ;;  %v1868_v23 = vld [vmem:[%s2386_s1 + $0x2b0] sm:$0xff]   ;;  %v1871_v26 = vld [vmem:[%s2386_s1 + $0x228] sm:$0xff]  }
  0x1d   :  { %1656 = vmatpush3.bf16.msra.mxu1 %v1824_v27  ;;  %1635 = vmatprep.subr.bf16.mxu0 %v1825_v28  ;;  %v1872_v27 = vld [vmem:[%s2386_s1 + $0x2a8] sm:$0xff]   ;;  %v1873_v28 = vld [vmem:[%s2386_s1 + $0x260] sm:$0xff]   ;;  %v1877_v32 = vld [vmem:[%s2386_s1 + $0x258] sm:$0xff]  }
  0x1e   :  { %1657 = vmatprep.subr.bf16.mxu1 %v1826_v29  ;;  %v1874_v29 = vld [vmem:[%s2386_s1 + $0x2e0] sm:$0xff]   ;;  %v1878_v33 = vld [vmem:[%s2386_s1 + $0x2d8] sm:$0xff]   ;;  %v1881_v36 = vld [vmem:[%s2386_s1 + $0x250] sm:$0xff]  }
  0x1f   :  { %v1879_v34 = vld [vmem:[%s2386_s1 + $0x218] sm:$0xff]   ;;  %v1882_v37 = vld [vmem:[%s2386_s1 + $0x2d0] sm:$0xff]  }
  0x20   :  { %1636 = vmatpush3.bf16.msra.mxu0 %v1827_v30  ;;  %v1875_v30 = vld [vmem:[%s2386_s1 + $0x220] sm:$0xff]   ;;  %v1884_v39 = vld [vmem:[%s2386_s1 + $0x290] sm:$0xff]   ;;  %v1909_v8 = vld [vmem:[%s2386_s1 + $0x358] sm:$0xff]  }
  0x21   :  { %1658 = vmatpush3.bf16.msra.mxu1 %v1828_v31  ;;  %1665 = vmatprep.subr.bf16.mxu0 %v1829_v40  ;;  %v1876_v31 = vld [vmem:[%s2386_s1 + $0x2a0] sm:$0xff]   ;;  %v1885_v40 = vld [vmem:[%s2386_s1 + $0x248] sm:$0xff]   ;;  %v1910_v9 = vld [vmem:[%s2386_s1 + $0x3d8] sm:$0xff]  }
  0x22   :  { %1687 = vmatprep.subr.bf16.mxu1 %v1830_v41  ;;  %v1886_v41 = vld [vmem:[%s2386_s1 + $0x2c8] sm:$0xff]   ;;  %v1913_v12 = vld [vmem:[%s2386_s1 + $0x350] sm:$0xff]  }
  0x23   :  { %1175 = vmatmul.mubr.bf16.vlgmr.msra.gmra.mxu0 %v1477_v35  ;;  %v1880_v35 = vld [vmem:[%s2386_s1 + $0x298] sm:$0xff]   ;;  %v1914_v13 = vld [vmem:[%s2386_s1 + $0x3d0] sm:$0xff]  }
  0x24   :  { %1216 = vmatmul.mubr.bf16.vlgmr.msra.gmra.mxu1 %v1479_v38  ;;  %1666 = vmatpush3.bf16.msra.mxu0 %v1831_v42  ;;  %v1883_v38 = vld [vmem:[%s2386_s1 + $0x210] sm:$0xff]   ;;  %v1887_v42 = vld [vmem:[%s2386_s1 + $0x208] sm:$0xff]  }
  0x25   :  { %1688 = vmatpush3.bf16.msra.mxu1 %v1832_v43  ;;  %1667 = vmatprep.subr.bf16.mxu0 %v1833_v44  ;;  %v1888_v43 = vld [vmem:[%s2386_s1 + $0x288] sm:$0xff]   ;;  %v1889_v44 = vld [vmem:[%s2386_s1 + $0x240] sm:$0xff]  }
  0x26   :  { %1689 = vmatprep.subr.bf16.mxu1 %v1834_v45  ;;  %1256 = vmatprep.mubr.bf16.mxu0 %v1482_v11  ;;  %v1890_v45 = vld [vmem:[%s2386_s1 + $0x2c0] sm:$0xff]   ;;  %v1912_v11 = vld [vmem:[%s2386_s1 + $0x398] sm:$0xff]  }
  0x27   :  { %1297 = vmatprep.mubr.bf16.mxu1 %v1484_v15  ;;  %v1916_v15 = vld [vmem:[%s2386_s1 + $0x390] sm:$0xff]  }
  0x28   :  { %1668 = vmatpush3.bf16.msra.mxu0 %v1835_v46  ;;  %v1891_v46 = vld [vmem:[%s2386_s1 + $0x200] sm:$0xff]  }
  0x29   :  { %1690 = vmatpush3.bf16.msra.mxu1 %v1836_v47  ;;  %1669 = vmatprep.subr.bf16.mxu0 %v1837_v48  ;;  %v1892_v47 = vld [vmem:[%s2386_s1 + $0x280] sm:$0xff]  }
  0x2a   :  { %1691 = vmatprep.subr.bf16.mxu1 %v1838_v49  ;;  %v19_v48 = vld [vmem:[%s2387_s0 + $0x20] sm:$0xff] }
  0x2b   :  { %v27_v49 = vld [vmem:[%s2387_s0 + $0x60] sm:$0xff] }
  0x2c   :  { %1670 = vmatpush3.bf16.msra.mxu0 %v1839_v50  ;;  %v20_v50 = vld [vmem:[%s2387_s0 + $0x28] sm:$0xff] }
  0x2d   :  { %1692 = vmatpush3.bf16.msra.mxu1 %v1840_v51  ;;  %1671 = vmatprep.subr.bf16.mxu0 %v1841_v52  ;;  %v28_v51 = vld [vmem:[%s2387_s0 + $0x68] sm:$0xff]  ;;  %v1485_v52 = vcombine.low %v19_v48, %v27_v49 }
  0x2e   :  { %1693 = vmatprep.subr.bf16.mxu1 %v1842_v53  ;;  %v1486_v53 = vcombine.high %v19_v48, %v27_v49  ;;  %v1476_v48 = vld [vmem:[%s2388_s2] ss:$0 sm:$0xff] }
  0x30   :  { %1672 = vmatpush3.bf16.msra.mxu0 %v1843_v54  ;;  %v1487_v54 = vcombine.low %v20_v50, %v28_v51 }
  0x31   :  { %1694 = vmatpush3.bf16.msra.mxu1 %v1844_v55  ;;  %1673 = vmatprep.subr.bf16.mxu0 %v1845_v56  ;;  %v1488_v55 = vcombine.high %v20_v50, %v28_v51  ;;  %v1893_v56 = vld [vmem:[%s2386_s1 + $0x378] sm:$0xff]  }
  0x32   :  { %1695 = vmatprep.subr.bf16.mxu1 %v1846_v57  ;;  %v1894_v57 = vld [vmem:[%s2386_s1 + $0x3f8] sm:$0xff]  }
  0x34   :  { %1674 = vmatpush3.bf16.msra.mxu0 %v1847_v58  ;;  %v1895_v58 = vld [vmem:[%s2386_s1 + $0x338] sm:$0xff]  }
  0x35   :  { %1696 = vmatpush3.bf16.msra.mxu1 %v1848_v59  ;;  %1675 = vmatprep.subr.bf16.mxu0 %v1849_v60  ;;  %v1896_v59 = vld [vmem:[%s2386_s1 + $0x3b8] sm:$0xff]   ;;  %v1897_v60 = vld [vmem:[%s2386_s1 + $0x370] sm:$0xff]  }
  0x36   :  { %1697 = vmatprep.subr.bf16.mxu1 %v1850_v61  ;;  %v1898_v61 = vld [vmem:[%s2386_s1 + $0x3f0] sm:$0xff]  }
  0x38   :  { %1676 = vmatpush3.bf16.msra.mxu0 %v1851_v62  ;;  %v1899_v62 = vld [vmem:[%s2386_s1 + $0x330] sm:$0xff]  }
  0x39   :  { %1698 = vmatpush3.bf16.msra.mxu1 %v1852_v63  ;;  %1677 = vmatprep.subr.bf16.mxu0 %v1853_v0  ;;  %v1900_v63 = vld [vmem:[%s2386_s1 + $0x3b0] sm:$0xff]   ;;  %v1901_v0 = vld [vmem:[%s2386_s1 + $0x368] sm:$0xff]  }
  0x3a   :  { %1699 = vmatprep.subr.bf16.mxu1 %v1854_v1  ;;  %v1902_v1 = vld [vmem:[%s2386_s1 + $0x3e8] sm:$0xff]  }
  0x3c   :  { %1678 = vmatpush3.bf16.msra.mxu0 %v1855_v2  ;;  %v1903_v2 = vld [vmem:[%s2386_s1 + $0x328] sm:$0xff]  }
  0x3d   :  { %1700 = vmatpush3.bf16.msra.mxu1 %v1856_v3  ;;  %1679 = vmatprep.subr.bf16.mxu0 %v1857_v4  ;;  %v1904_v3 = vld [vmem:[%s2386_s1 + $0x3a8] sm:$0xff]   ;;  %v1905_v4 = vld [vmem:[%s2386_s1 + $0x360] sm:$0xff]  }
  0x3e   :  { %1701 = vmatprep.subr.bf16.mxu1 %v1858_v5  ;;  %v1906_v5 = vld [vmem:[%s2386_s1 + $0x3e0] sm:$0xff]  }
  0x40   :  { %1680 = vmatpush3.bf16.msra.mxu0 %v1859_v6  ;;  %v1907_v6 = vld [vmem:[%s2386_s1 + $0x320] sm:$0xff]  }
  0x41   :  { %1702 = vmatpush3.bf16.msra.mxu1 %v1860_v7  ;;  %1709 = vmatprep.subr.bf16.mxu0 %v1861_v16  ;;  %v1908_v7 = vld [vmem:[%s2386_s1 + $0x3a0] sm:$0xff]   ;;  %v1917_v16 = vld [vmem:[%s2386_s1 + $0x348] sm:$0xff]  }
  0x42   :  { %1731 = vmatprep.subr.bf16.mxu1 %v1862_v17  ;;  %v1918_v17 = vld [vmem:[%s2386_s1 + $0x3c8] sm:$0xff]  }
  0x43   :  { %1257 = vmatmul.mubr.bf16.vlgmr.msra.gmra.mxu0 %v1481_v10  ;;  %v1911_v10 = vld [vmem:[%s2386_s1 + $0x318] sm:$0xff]  }
  0x44   :  { %1298 = vmatmul.mubr.bf16.vlgmr.msra.gmra.mxu1 %v1483_v14  ;;  %1710 = vmatpush3.bf16.msra.mxu0 %v1863_v18  ;;  %v1915_v14 = vld [vmem:[%s2386_s1 + $0x310] sm:$0xff]   ;;  %v1919_v18 = vld [vmem:[%s2386_s1 + $0x308] sm:$0xff]  }
  0x45   :  { %1732 = vmatpush3.bf16.msra.mxu1 %v1864_v19  ;;  %1711 = vmatprep.subr.bf16.mxu0 %v1865_v20  ;;  %v1920_v19 = vld [vmem:[%s2386_s1 + $0x388] sm:$0xff]   ;;  %v1921_v20 = vld [vmem:[%s2386_s1 + $0x340] sm:$0xff]  }
  0x46   :  { %1733 = vmatprep.subr.bf16.mxu1 %v1866_v21  ;;  %1338 = vmatprep.mubr.bf16.mxu0 %v1486_v53  ;;  %v1922_v21 = vld [vmem:[%s2386_s1 + $0x3c0] sm:$0xff]  }
  0x47   :  { %1379 = vmatprep.mubr.bf16.mxu1 %v1488_v55 }
  0x48   :  { %1712 = vmatpush3.bf16.msra.mxu0 %v1867_v22  ;;  %v1923_v22 = vld [vmem:[%s2386_s1 + $0x300] sm:$0xff]  }
  0x49   :  { %1734 = vmatpush3.bf16.msra.mxu1 %v1868_v23  ;;  %1713 = vmatprep.subr.bf16.mxu0 %v1869_v24  ;;  %v1924_v23 = vld [vmem:[%s2386_s1 + $0x380] sm:$0xff]   ;;  %v21_v24 = vld [vmem:[%s2387_s0 + $0x30] sm:$0xff] }
  0x4a   :  { %1735 = vmatprep.subr.bf16.mxu1 %v1870_v25  ;;  %v29_v25 = vld [vmem:[%s2387_s0 + $0x70] sm:$0xff] }
  0x4c   :  { %1714 = vmatpush3.bf16.msra.mxu0 %v1871_v26  ;;  %v22_v26 = vld [vmem:[%s2387_s0 + $0x38] sm:$0xff] }
  0x4d   :  { %1736 = vmatpush3.bf16.msra.mxu1 %v1872_v27  ;;  %1715 = vmatprep.subr.bf16.mxu0 %v1873_v28  ;;  %v1489_v27 = vcombine.low %v21_v24, %v29_v25  ;;  %v1490_v28 = vcombine.high %v21_v24, %v29_v25 }
  0x4e   :  { %1737 = vmatprep.subr.bf16.mxu1 %v1874_v29  ;;  %v30_v29 = vld [vmem:[%s2387_s0 + $0x78] sm:$0xff] }
  0x50   :  { %1716 = vmatpush3.bf16.msra.mxu0 %v1875_v30  ;;  %v1491_v30 = vcombine.low %v22_v26, %v30_v29 }
  0x51   :  { %1738 = vmatpush3.bf16.msra.mxu1 %v1876_v31  ;;  %1717 = vmatprep.subr.bf16.mxu0 %v1877_v32  ;;  %v1492_v31 = vcombine.high %v22_v26, %v30_v29 }
  0x52   :  { %1739 = vmatprep.subr.bf16.mxu1 %v1878_v33 }
  0x54   :  { %1718 = vmatpush3.bf16.msra.mxu0 %v1879_v34 }
  0x55   :  { %1740 = vmatpush3.bf16.msra.mxu1 %v1880_v35  ;;  %1719 = vmatprep.subr.bf16.mxu0 %v1881_v36 }
  0x56   :  { %1741 = vmatprep.subr.bf16.mxu1 %v1882_v37 }
  0x58   :  { %1720 = vmatpush3.bf16.msra.mxu0 %v1883_v38 }
  0x59   :  { %1742 = vmatpush3.bf16.msra.mxu1 %v1884_v39  ;;  %1721 = vmatprep.subr.bf16.mxu0 %v1885_v40 }
  0x5a   :  { %1743 = vmatprep.subr.bf16.mxu1 %v1886_v41 }
  0x5c   :  { %1722 = vmatpush3.bf16.msra.mxu0 %v1887_v42 }
  0x5d   :  { %1744 = vmatpush3.bf16.msra.mxu1 %v1888_v43  ;;  %1723 = vmatprep.subr.bf16.mxu0 %v1889_v44 }
  0x5e   :  { %1745 = vmatprep.subr.bf16.mxu1 %v1890_v45 }
  0x60   :  { %1724 = vmatpush3.bf16.msra.mxu0 %v1891_v46 }
  0x61   :  { %1746 = vmatpush3.bf16.msra.mxu1 %v1892_v47  ;;  %1753 = vmatprep.subr.bf16.mxu0 %v1893_v56 }
  0x62   :  { %1775 = vmatprep.subr.bf16.mxu1 %v1894_v57 }
  0x63   :  { %1339 = vmatmul.mubr.bf16.vlgmr.msra.gmra.mxu0 %v1485_v52 }
  0x64   :  { %1380 = vmatmul.mubr.bf16.vlgmr.msra.gmra.mxu1 %v1487_v54  ;;  %1754 = vmatpush3.bf16.msra.mxu0 %v1895_v58 }
  0x65   :  { %1776 = vmatpush3.bf16.msra.mxu1 %v1896_v59  ;;  %1755 = vmatprep.subr.bf16.mxu0 %v1897_v60 }
  0x66   :  { %1777 = vmatprep.subr.bf16.mxu1 %v1898_v61  ;;  %1420 = vmatprep.mubr.bf16.mxu0 %v1490_v28 }
  0x67   :  { %1461 = vmatprep.mubr.bf16.mxu1 %v1492_v31 }
  0x68   :  { %1756 = vmatpush3.bf16.msra.mxu0 %v1899_v62 }
  0x69   :  { %1778 = vmatpush3.bf16.msra.mxu1 %v1900_v63  ;;  %1757 = vmatprep.subr.bf16.mxu0 %v1901_v0 }
  0x6a   :  { %1779 = vmatprep.subr.bf16.mxu1 %v1902_v1 }
  0x6c   :  { %1758 = vmatpush3.bf16.msra.mxu0 %v1903_v2 }
  0x6d   :  { %1780 = vmatpush3.bf16.msra.mxu1 %v1904_v3  ;;  %1759 = vmatprep.subr.bf16.mxu0 %v1905_v4 }
  0x6e   :  { %1781 = vmatprep.subr.bf16.mxu1 %v1906_v5 }
  0x70   :  { %1760 = vmatpush3.bf16.msra.mxu0 %v1907_v6 }
  0x71   :  { %1782 = vmatpush3.bf16.msra.mxu1 %v1908_v7  ;;  %1761 = vmatprep.subr.bf16.mxu0 %v1909_v8 }
  0x72   :  { %1783 = vmatprep.subr.bf16.mxu1 %v1910_v9 }
  0x74   :  { %1762 = vmatpush3.bf16.msra.mxu0 %v1911_v10 }
  0x75   :  { %1784 = vmatpush3.bf16.msra.mxu1 %v1912_v11  ;;  %1763 = vmatprep.subr.bf16.mxu0 %v1913_v12 }
  0x76   :  { %1785 = vmatprep.subr.bf16.mxu1 %v1914_v13 }
  0x78   :  { %1764 = vmatpush3.bf16.msra.mxu0 %v1915_v14 }
  0x79   :  { %1786 = vmatpush3.bf16.msra.mxu1 %v1916_v15  ;;  %1765 = vmatprep.subr.bf16.mxu0 %v1917_v16 }
  0x7a   :  { %1787 = vmatprep.subr.bf16.mxu1 %v1918_v17 }
  0x7c   :  { %1766 = vmatpush3.bf16.msra.mxu0 %v1919_v18 }
  0x7d   :  { %1788 = vmatpush3.bf16.msra.mxu1 %v1920_v19  ;;  %1767 = vmatprep.subr.bf16.mxu0 %v1921_v20 }
  0x7e   :  { %1789 = vmatprep.subr.bf16.mxu1 %v1922_v21 }
  0x80   :  { %1768 = vmatpush3.bf16.msra.mxu0 %v1923_v22 }
  0x81   :  { %1790 = vmatpush3.bf16.msra.mxu1 %v1924_v23 }
  0x83   :  { %1421 = vmatmul.mubr.bf16.vlgmr.msra.gmra.mxu0 %v1489_v27 }
  0x84   :  { %1462 = vmatmul.mubr.bf16.vlgmr.msra.gmra.mxu1 %v1491_v30 }
  0xe3   :  { %v1637_v32 = vpop.f32.mrf.mxu0 }
  0xe4   :  { %v1659_v33 = vpop.f32.mrf.mxu1 }
  0xe5   :  { %v1638_v34 = vpop.f32.mrf.mxu0 }
  0xe6   :  { %v1660_v35 = vpop.f32.mrf.mxu1  ;;  %v1639_v47 = vadd.f32 %v1638_v34, %v1637_v32 }
  0xe7   :  { %v1640_v36 = vpop.f32.mrf.mxu0  ;;  %v1661_v52 = vadd.f32 %v1660_v35, %v1659_v33 }
  0xe8   :  { %v1662_v37 = vpop.f32.mrf.mxu1  ;;  %v1177_v51 = vadd.f32 %v1639_v47, %v1476_v48 }
  0xe9   :  { %v1641_v38 = vpop.f32.mrf.mxu0 }
  0xea   :  { %v1663_v40 = vpop.f32.mrf.mxu1  ;;  %v1642_v53 = vadd.f32 %v1641_v38, %v1640_v36  ;;  %v1218_v57 = vadd.f32 %v1661_v52, %v1177_v51 }
  0xeb   :  { %v1664_v61 = vadd.f32 %v1663_v40, %v1662_v37 }
  0xec   :  { %v1180_v58 = vadd.f32 %v1642_v53, %v1476_v48 }
  0xee   :  { %v1221_v1 = vadd.f32 %v1664_v61, %v1180_v58 }
 0x103   :  { %v1681_v39 = vpop.f32.mrf.mxu0 }
 0x104   :  { %v1703_v41 = vpop.f32.mrf.mxu1 }
 0x105   :  { %v1682_v42 = vpop.f32.mrf.mxu0 }
 0x106   :  { %v1704_v43 = vpop.f32.mrf.mxu1  ;;  %v1683_v56 = vadd.f32 %v1682_v42, %v1681_v39 }
 0x107   :  { %v1684_v44 = vpop.f32.mrf.mxu0  ;;  %v1705_v63 = vadd.f32 %v1704_v43, %v1703_v41 }
 0x108   :  { %v1706_v45 = vpop.f32.mrf.mxu1  ;;  %v1259_v62 = vadd.f32 %v1683_v56, %v1218_v57 }
 0x109   :  { %v1685_v46 = vpop.f32.mrf.mxu0 }
 0x10a   :  { %v1707_v50 = vpop.f32.mrf.mxu1  ;;  %v1686_v0 = vadd.f32 %v1685_v46, %v1684_v44  ;;  %v1300_v5 = vadd.f32 %v1705_v63, %v1259_v62 }
 0x10b   :  { %v1708_v7 = vadd.f32 %v1707_v50, %v1706_v45 }
 0x10c   :  { %v1262_v6 = vadd.f32 %v1686_v0, %v1221_v1 }
 0x10e   :  { %v1303_v13 = vadd.f32 %v1708_v7, %v1262_v6 }
 0x123   :  { %v1725_v49 = vpop.f32.mrf.mxu0 }
 0x124   :  { %v1747_v54 = vpop.f32.mrf.mxu1 }
 0x125   :  { %v1726_v55 = vpop.f32.mrf.mxu0 }
 0x126   :  { %v1748_v59 = vpop.f32.mrf.mxu1  ;;  %v1727_v2 = vadd.f32 %v1726_v55, %v1725_v49 }
 0x127   :  { %v1728_v60 = vpop.f32.mrf.mxu0  ;;  %v1749_v9 = vadd.f32 %v1748_v59, %v1747_v54 }
 0x128   :  { %v1750_v3 = vpop.f32.mrf.mxu1  ;;  %v1341_v8 = vadd.f32 %v1727_v2, %v1300_v5 }
 0x129   :  { %v1729_v4 = vpop.f32.mrf.mxu0 }
 0x12a   :  { %v1730_v10 = vadd.f32 %v1729_v4, %v1728_v60  ;;  %v1751_v11 = vpop.f32.mrf.mxu1  ;;  %v1382_v16 = vadd.f32 %v1749_v9, %v1341_v8 }
 0x12b   :  { %v1752_v21 = vadd.f32 %v1751_v11, %v1750_v3 }
 0x12c   :  { %v1344_v17 = vadd.f32 %v1730_v10, %v1303_v13 }
 0x12e   :  { %v1385_v26 = vadd.f32 %v1752_v21, %v1344_v17 }
 0x143   :  { %v1769_v12 = vpop.f32.mrf.mxu0 }
 0x144   :  { %v1791_v14 = vpop.f32.mrf.mxu1 }
 0x145   :  { %v1770_v15 = vpop.f32.mrf.mxu0 }
 0x146   :  { %v1771_v18 = vadd.f32 %v1770_v15, %v1769_v12  ;;  %v1792_v19 = vpop.f32.mrf.mxu1 }
 0x147   :  { %v1772_v20 = vpop.f32.mrf.mxu0  ;;  %v1793_v23 = vadd.f32 %v1792_v19, %v1791_v14 }
 0x148   :  { %v1423_v22 = vadd.f32 %v1771_v18, %v1382_v16  ;;  %v1794_v24 = vpop.f32.mrf.mxu1 }
 0x149   :  { %v1773_v25 = vpop.f32.mrf.mxu0 }
 0x14a   :  { %v1464_v27 = vadd.f32 %v1793_v23, %v1423_v22  ;;  %v1774_v28 = vadd.f32 %v1773_v25, %v1772_v20  ;;  %v1795_v29 = vpop.f32.mrf.mxu1 }
 0x14b   :  { %v1796_v31 = vadd.f32 %v1795_v29, %v1794_v24 }
 0x14c   :  { %1470 = vst [vmem:[%s2389_s3] sm:$0xff] %v1464_v27  ;;  %v1426_v30 = vadd.f32 %v1774_v28, %v1385_v26 }
 0x14e   :  { %v1467_v32 = vadd.f32 %v1796_v31, %v1426_v30 }
 0x150   :  { %1471 = vst [vmem:[%s2389_s3 + $0x8] sm:$0xff] %v1467_v32 }

</bundles_post_ra>
